<compile_context>
chip_gen: v6e
topology: v6e:2x2x1
jax: 0.10.0
libtpu: 0.0.40
codegen_flags: <defaults>
</compile_context>

<pallas_src>
import functools
import math

import jax
import jax.numpy as jnp
from jax import lax
from jax.experimental import pallas as pl
from jax.experimental.pallas import tpu as pltpu


# ----------------------------- config ---------------------------------------
class Config:
    hidden_size = 128
    intermediate_size = 256
    num_attention_heads = 4
    num_key_value_heads = 2
    num_hidden_layers = 2
    vocab_size = 256
    rms_norm_eps = 1e-6
    rope_theta = 10000.0
    max_position_embeddings = 64
    hidden_act = "silu"
    attention_dropout = 0.0   # 0.0 in the reference config -> no-op
    tp = 4                    # ray tensor-parallel width; numerically a no-op


# =============================================================================
# Kernel 1: RMSNorm -> Q/K/V projections -> RoPE      (one batch per grid step)
# =============================================================================
def _ln_qkv_rope_kernel(x_ref, lnw_ref, wq_ref, wk_ref, wv_ref,
                        cos_ref, sin_ref, q_ref, k_ref, v_ref,
                        *, eps, nH, nKV, D):
    x = x_ref[...]                                        # (S, H) f32
    var = jnp.mean(x * x, axis=-1, keepdims=True)
    xn = x * lax.rsqrt(var + eps) * lnw_ref[...]          # RMSNorm

    q = jnp.dot(xn, wq_ref[...], preferred_element_type=jnp.float32)   # (S, nH*D)
    k = jnp.dot(xn, wk_ref[...], preferred_element_type=jnp.float32)   # (S, nKV*D)
    v = jnp.dot(xn, wv_ref[...], preferred_element_type=jnp.float32)   # (S, nKV*D)

    cos = cos_ref[...]                                    # (S, D)
    sin = sin_ref[...]

    def rope(t, n_heads):
        # HF half-rotation convention, per head, on static lane slices while
        # everything is still resident in vregs (no extra HBM round trips).
        outs = []
        for h in range(n_heads):
            th = t[:, h * D:(h + 1) * D]                                  # (S, D)
            th_rot = jnp.concatenate([-th[:, D // 2:], th[:, :D // 2]], axis=-1)
            outs.append(th * cos + th_rot * sin)
        return jnp.concatenate(outs, axis=-1)

    q_ref[...] = rope(q, nH)
    k_ref[...] = rope(k, nKV)
    v_ref[...] = v


def fused_ln_qkv_rope(h2d, ln_w, wq, wk, wv, cos, sin, B, S, cfg):
    H = cfg.hidden_size
    nH, nKV = cfg.num_attention_heads, cfg.num_key_value_heads
    D = H // nH
    kern = functools.partial(_ln_qkv_rope_kernel, eps=cfg.rms_norm_eps,
                             nH=nH, nKV=nKV, D=D)
    return pl.pallas_call(
        kern,
        out_shape=(jax.ShapeDtypeStruct((B * S, nH * D), jnp.float32),
                   jax.ShapeDtypeStruct((B * S, nKV * D), jnp.float32),
                   jax.ShapeDtypeStruct((B * S, nKV * D), jnp.float32)),
        grid=(B,),
        in_specs=[
            pl.BlockSpec((S, H), lambda b: (b, 0)),
            pl.BlockSpec((1, H), lambda b: (0, 0)),
            pl.BlockSpec((H, nH * D), lambda b: (0, 0)),
            pl.BlockSpec((H, nKV * D), lambda b: (0, 0)),
            pl.BlockSpec((H, nKV * D), lambda b: (0, 0)),
            pl.BlockSpec((S, D), lambda b: (0, 0)),
            pl.BlockSpec((S, D), lambda b: (0, 0)),
        ],
        out_specs=(
            pl.BlockSpec((S, nH * D), lambda b: (b, 0)),
            pl.BlockSpec((S, nKV * D), lambda b: (b, 0)),
            pl.BlockSpec((S, nKV * D), lambda b: (b, 0)),
        ),
        compiler_params=pltpu.CompilerParams(dimension_semantics=("parallel",)),
    )(h2d, ln_w.reshape(1, H), wq, wk, wv, cos, sin)


# =============================================================================
# Kernel 2: causal GQA attention -> o_proj -> residual add   (one batch / step)
# =============================================================================
def _attn_oproj_kernel(q_ref, k_ref, v_ref, wo_ref, res_ref, o_ref,
                       *, nH, nKV, D, scale):
    q = q_ref[...]                                        # (S, nH*D)
    k = k_ref[...]                                        # (S, nKV*D)  NOT repeated
    v = v_ref[...]
    res = res_ref[...]                                    # (S, H) pre-norm residual
    S = q.shape[0]
    groups = nH // nKV

    row = lax.broadcasted_iota(jnp.int32, (S, S), 0)
    col = lax.broadcasted_iota(jnp.int32, (S, S), 1)
    causal = col <= row

    heads = []
    for h in range(nH):
        kvh = h // groups                                 # GQA: reuse KV tile in VMEM
        qh = q[:, h * D:(h + 1) * D]
        kh = k[:, kvh * D:(kvh + 1) * D]
        vh = v[:, kvh * D:(kvh + 1) * D]
        s = lax.dot_general(qh, kh, (((1,), (1,)), ((), ())),
                            preferred_element_type=jnp.float32) * scale
        s = jnp.where(causal, s, -1e30)
        s = s - jnp.max(s, axis=-1, keepdims=True)
        p = jnp.exp(s)
        p = p / jnp.sum(p, axis=-1, keepdims=True)
        heads.append(jnp.dot(p, vh, preferred_element_type=jnp.float32))
    attn = jnp.concatenate(heads, axis=-1)                # (S, nH*D): lane-dense 128

    # o_proj + residual add fused into the epilogue (accumulator still in vregs).
    o_ref[...] = jnp.dot(attn, wo_ref[...],
                         preferred_element_type=jnp.float32) + res
    # TODO(synk): for long sequences convert to an online-softmax (flash)
    # formulation with a KV-block grid axis instead of the full SxS scores.


def fused_attn_oproj_residual(q, k, v, wo, resid, B, S, cfg):
    H = cfg.hidden_size
    nH, nKV = cfg.num_attention_heads, cfg.num_key_value_heads
    D = H // nH
    kern = functools.partial(_attn_oproj_kernel, nH=nH, nKV=nKV, D=D,
                             scale=1.0 / math.sqrt(D))
    return pl.pallas_call(
        kern,
        out_shape=jax.ShapeDtypeStruct((B * S, H), jnp.float32),
        grid=(B,),
        in_specs=[
            pl.BlockSpec((S, nH * D), lambda b: (b, 0)),
            pl.BlockSpec((S, nKV * D), lambda b: (b, 0)),
            pl.BlockSpec((S, nKV * D), lambda b: (b, 0)),
            pl.BlockSpec((H, H), lambda b: (0, 0)),
            pl.BlockSpec((S, H), lambda b: (b, 0)),
        ],
        out_specs=pl.BlockSpec((S, H), lambda b: (b, 0)),
        compiler_params=pltpu.CompilerParams(dimension_semantics=("parallel",)),
    )(q, k, v, wo, resid)


# =============================================================================
# Kernel 3: RMSNorm -> SwiGLU MLP -> residual add     (token-tile grid)
# =============================================================================
def _ln_mlp_res_kernel(x_ref, lnw_ref, wg_ref, wu_ref, wd_ref, o_ref, *, eps):
    x = x_ref[...]                                        # (TM, H)
    var = jnp.mean(x * x, axis=-1, keepdims=True)
    xn = x * lax.rsqrt(var + eps) * lnw_ref[...]
    g = jnp.dot(xn, wg_ref[...], preferred_element_type=jnp.float32)
    u = jnp.dot(xn, wu_ref[...], preferred_element_type=jnp.float32)
    inter = (g * jax.nn.sigmoid(g)) * u                   # SiLU(gate) * up
    o_ref[...] = jnp.dot(inter, wd_ref[...],
                         preferred_element_type=jnp.float32) + x


def fused_ln_mlp_residual(h2d, ln_w, wg, wu, wd, cfg, tm=8):
    N, H = h2d.shape
    I = wg.shape[1]
    assert N % tm == 0
    kern = functools.partial(_ln_mlp_res_kernel, eps=cfg.rms_norm_eps)
    return pl.pallas_call(
        kern,
        out_shape=jax.ShapeDtypeStruct((N, H), jnp.float32),
        grid=(N // tm,),
        in_specs=[
            pl.BlockSpec((tm, H), lambda i: (i, 0)),
            pl.BlockSpec((1, H), lambda i: (0, 0)),
            pl.BlockSpec((H, I), lambda i: (0, 0)),
            pl.BlockSpec((H, I), lambda i: (0, 0)),
            pl.BlockSpec((I, H), lambda i: (0, 0)),
        ],
        out_specs=pl.BlockSpec((tm, H), lambda i: (i, 0)),
        compiler_params=pltpu.CompilerParams(dimension_semantics=("parallel",)),
    )(h2d, ln_w.reshape(1, H), wg, wu, wd)


# =============================================================================
# Kernel 4: final RMSNorm -> lm_head                  (token x vocab tile grid)
# =============================================================================
def _ln_lmhead_kernel(x_ref, lnw_ref, w_ref, o_ref, *, eps):
    x = x_ref[...]
    var = jnp.mean(x * x, axis=-1, keepdims=True)
    xn = x * lax.rsqrt(var + eps) * lnw_ref[...]
    o_ref[...] = jnp.dot(xn, w_ref[...], preferred_element_type=jnp.float32)


def fused_final_norm_lm_head(h2d, norm_w, w_t, cfg, tm=8, tn=128):
    N, H = h2d.shape
    V = w_t.shape[1]
    assert N % tm == 0 and V % tn == 0
    kern = functools.partial(_ln_lmhead_kernel, eps=cfg.rms_norm_eps)
    return pl.pallas_call(
        kern,
        out_shape=jax.ShapeDtypeStruct((N, V), jnp.float32),
        grid=(N // tm, V // tn),
        in_specs=[
            pl.BlockSpec((tm, H), lambda i, j: (i, 0)),
            pl.BlockSpec((1, H), lambda i, j: (0, 0)),
            pl.BlockSpec((H, tn), lambda i, j: (0, j)),
        ],
        out_specs=pl.BlockSpec((tm, tn), lambda i, j: (i, j)),
        compiler_params=pltpu.CompilerParams(
            dimension_semantics=("parallel", "parallel")),
    )(h2d, norm_w.reshape(1, H), w_t)
    # TODO(synk): at real hidden/vocab sizes add a K (hidden) reduction grid
    # axis with a VMEM accumulator + pl.when init/finalize.


# ----------------------------- RoPE tables -----------------------------------
def rope_cos_sin(seq_len, head_dim, theta):
    inv_freq = 1.0 / (theta ** (jnp.arange(0, head_dim, 2, dtype=jnp.float32)
                                / head_dim))
    pos = jnp.arange(seq_len, dtype=jnp.float32)
    freqs = jnp.outer(pos, inv_freq)                      # (S, D/2)
    emb = jnp.concatenate([freqs, freqs], axis=-1)        # (S, D)
    return jnp.cos(emb), jnp.sin(emb)


# ----------------------------- model forward ---------------------------------
def llama_forward(input_embeds, params, cfg):
    B, S, H = input_embeds.shape
    D = H // cfg.num_attention_heads
    cos, sin = rope_cos_sin(S, D, cfg.rope_theta)         # prefill positions 0..S-1
    h2d = input_embeds.reshape(B * S, H)                  # contiguous, free reshape
    for lp in params["layers"]:
        q, k, v = fused_ln_qkv_rope(h2d, lp["input_ln"], lp["wq"], lp["wk"],
                                    lp["wv"], cos, sin, B, S, cfg)
        h2d = fused_attn_oproj_residual(q, k, v, lp["wo"], h2d, B, S, cfg)
        h2d = fused_ln_mlp_residual(h2d, lp["post_ln"], lp["wg"], lp["wu"],
                                    lp["wd"], cfg)
    logits = fused_final_norm_lm_head(h2d, params["final_norm"],
                                      params["lm_head_t"], cfg)
    return logits.reshape(B, S, cfg.vocab_size)
    # TODO(synk): DynamicCache (past_key_values) incremental decode not modeled;
    # this implements the prefill (no-cache) forward with positions 0..S-1.


# ----------------------------- params ----------------------------------------
def init_params(cfg, key):
    """PyTorch-convention (out, in) weights, as the original module stores them."""
    def nrm(k, shape, scale=0.02):
        return scale * jax.random.normal(k, shape, dtype=jnp.float32)

    H, I, V = cfg.hidden_size, cfg.intermediate_size, cfg.vocab_size
    nH, nKV = cfg.num_attention_heads, cfg.num_key_value_heads
    D = H // nH

    keys = jax.random.split(key, 2 + cfg.num_hidden_layers)
    raw = {
        "embed_tokens": nrm(keys[0], (V, H)),
        "lm_head": nrm(keys[1], (V, H)),
        "final_norm": jnp.ones((H,), jnp.float32),
        "layers": [],
    }
    for li in range(cfg.num_hidden_layers):
        ks = jax.random.split(keys[2 + li], 7)
        raw["layers"].append({
            "q_proj": nrm(ks[0], (nH * D, H)),
            "k_proj": nrm(ks[1], (nKV * D, H)),
            "v_proj": nrm(ks[2], (nKV * D, H)),
            "o_proj": nrm(ks[3], (H, H)),
            "gate_proj": nrm(ks[4], (I, H)),
            "up_proj": nrm(ks[5], (I, H)),
            "down_proj": nrm(ks[6], (H, I)),
            "input_ln": jnp.ones((H,), jnp.float32),
            "post_ln": jnp.ones((H,), jnp.float32),
        })
    return raw


def prepare_params(raw):
    """One-time transpose to (in, out) so every kernel matmul is plain x @ W."""
    prepped = {
        "final_norm": raw["final_norm"],
        "lm_head_t": raw["lm_head"].T,          # (H, V)
        "layers": [],
    }
    for lp in raw["layers"]:
        prepped["layers"].append({
            "input_ln": lp["input_ln"],
            "post_ln": lp["post_ln"],
            "wq": lp["q_proj"].T,               # (H, nH*D)
            "wk": lp["k_proj"].T,               # (H, nKV*D)
            "wv": lp["v_proj"].T,
            "wo": lp["o_proj"].T,               # (H, H)
            "wg": lp["gate_proj"].T,            # (H, I)
            "wu": lp["up_proj"].T,
            "wd": lp["down_proj"].T,            # (I, H)
        })
    return prepped


# ----------------------------- pure-JAX reference -----------------------------
def reference_forward(input_embeds, position_ids, raw, cfg):
    """Plain-jnp mirror of the PyTorch module (F.linear / sdpa / HF RoPE)."""
    B, S, H = input_embeds.shape
    nH, nKV = cfg.num_attention_heads, cfg.num_key_value_heads
    D = H // nH
    groups = nH // nKV
    eps = cfg.rms_norm_eps

    def rms(x, w):
        var = jnp.mean(x * x, axis=-1, keepdims=True)
        return x * lax.rsqrt(var + eps) * w

    def rot_half(x):
        return jnp.concatenate([-x[..., D // 2:], x[..., :D // 2]], axis=-1)

    cos, sin = rope_cos_sin(S, D, cfg.rope_theta)
    h = input_embeds
    for lp in raw["layers"]:
        res = h
        hn = rms(h, lp["input_ln"])
        q = (hn @ lp["q_proj"].T).reshape(B, S, nH, D).transpose(0, 2, 1, 3)
        k = (hn @ lp["k_proj"].T).reshape(B, S, nKV, D).transpose(0, 2, 1, 3)
        v = (hn @ lp["v_proj"].T).reshape(B, S, nKV, D).transpose(0, 2, 1, 3)
        cos_p = cos[position_ids][:, None]
        sin_p = sin[position_ids][:, None]
        q = q * cos_p + rot_half(q) * sin_p
        k = k * cos_p + rot_half(k) * sin_p
        k = jnp.repeat(k, groups, axis=1)
        v = jnp.repeat(v, groups, axis=1)
        s = jnp.einsum("bhqd,bhkd->bhqk", q, k) / math.sqrt(D)
        mask = jnp.tril(jnp.ones((S, S), bool))
        s = jnp.where(mask, s, -jnp.inf)
        p = jax.nn.softmax(s, axis=-1)
        attn = jnp.einsum("bhqk,bhkd->bhqd", p, v).transpose(0, 2, 1, 3)
        attn = attn.reshape(B, S, H)
        h = res + attn @ lp["o_proj"].T
        res = h
        hn = rms(h, lp["post_ln"])
        g = hn @ lp["gate_proj"].T
        u = hn @ lp["up_proj"].T
        h = res + (jax.nn.silu(g) * u) @ lp["down_proj"].T
    hn = rms(h, raw["final_norm"])
    return hn @ raw["lm_head"].T


# ----------------------------- main -------------------------------------------
if __name__ == "__main__":
    cfg = Config()
    key = jax.random.PRNGKey(0)
    k_params, k_ids = jax.random.split(key)

    raw_params = init_params(cfg, k_params)
    params = prepare_params(raw_params)

    batch, seq = 2, 8
    input_ids = jax.random.randint(k_ids, (batch, seq), 0, cfg.vocab_size)
    input_embeds = raw_params["embed_tokens"][input_ids]          # (B, S, H)
    position_ids = jnp.broadcast_to(
        jnp.arange(seq, dtype=jnp.int32)[None, :], (batch, seq))

    fwd = jax.jit(functools.partial(llama_forward, cfg=cfg))
    logits = jax.block_until_ready(fwd(input_embeds, params))

    assert logits.shape == (batch, seq, cfg.vocab_size)
    assert bool(jnp.all(jnp.isfinite(logits)))

    # correctness check against a pure-JAX reference of the same math
    ref = reference_forward(input_embeds, position_ids, raw_params, cfg)
    max_err = float(jnp.max(jnp.abs(logits - ref)))
    assert max_err < 2e-2, f"kernel vs reference mismatch: {max_err}"

    print("KERNEL_OK")
</pallas_src>

<mosaic_0001>
module attributes {stable_mosaic.version = 11 : i64} {
  func.func @_ln_qkv_rope_kernel(%arg0: i32, %arg1: memref<8x128xf32, #tpu.memory_space<vmem>>, %arg2: memref<1x128xf32, #tpu.memory_space<vmem>>, %arg3: memref<128x128xf32, #tpu.memory_space<vmem>>, %arg4: memref<128x64xf32, #tpu.memory_space<vmem>>, %arg5: memref<128x64xf32, #tpu.memory_space<vmem>>, %arg6: memref<8x32xf32, #tpu.memory_space<vmem>>, %arg7: memref<8x32xf32, #tpu.memory_space<vmem>>, %arg8: memref<8x128xf32, #tpu.memory_space<vmem>>, %arg9: memref<8x64xf32, #tpu.memory_space<vmem>>, %arg10: memref<8x64xf32, #tpu.memory_space<vmem>>) attributes {dimension_semantics = [#tpu.dimension_semantics<parallel>], iteration_bounds = array<i64: 2>, scalar_prefetch = 0 : i64, scratch_operands = 0 : i64, tpu.core_type = #tpu.core_type<tc>, window_params = [{transform_indices = @transform_0, window_bounds = array<i64: 8, 128>}, {pipeline_mode = #tpu.pipeline_mode<synchronous>, transform_indices = @transform_1, window_bounds = array<i64: 1, 128>}, {pipeline_mode = #tpu.pipeline_mode<synchronous>, transform_indices = @transform_2, window_bounds = array<i64: 128, 128>}, {pipeline_mode = #tpu.pipeline_mode<synchronous>, transform_indices = @transform_3, window_bounds = array<i64: 128, 64>}, {pipeline_mode = #tpu.pipeline_mode<synchronous>, transform_indices = @transform_4, window_bounds = array<i64: 128, 64>}, {pipeline_mode = #tpu.pipeline_mode<synchronous>, transform_indices = @transform_5, window_bounds = array<i64: 8, 32>}, {pipeline_mode = #tpu.pipeline_mode<synchronous>, transform_indices = @transform_6, window_bounds = array<i64: 8, 32>}, {transform_indices = @transform_7, window_bounds = array<i64: 8, 128>}, {transform_indices = @transform_8, window_bounds = array<i64: 8, 64>}, {transform_indices = @transform_9, window_bounds = array<i64: 8, 64>}]} {
    %c0 = arith.constant 0 : index
    %c0_0 = arith.constant 0 : index
    %0 = vector.load %arg1[%c0, %c0_0] : memref<8x128xf32, #tpu.memory_space<vmem>>, vector<8x128xf32>
    %1 = arith.mulf %0, %0 : vector<8x128xf32>
    %cst = arith.constant dense<0.000000e+00> : vector<8xf32>
    %2 = vector.multi_reduction <add>, %1, %cst [1] : vector<8x128xf32> to vector<8xf32>
    %3 = vector.shape_cast %2 : vector<8xf32> to vector<8x1xf32>
    %cst_1 = arith.constant 1.280000e+02 : f32
    %4 = vector.broadcast %cst_1 : f32 to vector<8x1xf32>
    %5 = arith.divf %3, %4 : vector<8x1xf32>
    %cst_2 = arith.constant 9.99999997E-7 : f32
    %6 = vector.broadcast %cst_2 : f32 to vector<8x1xf32>
    %7 = arith.addf %5, %6 : vector<8x1xf32>
    %8 = math.rsqrt %7 : vector<8x1xf32>
    %9 = vector.broadcast %8 : vector<8x1xf32> to vector<8x128xf32>
    %10 = arith.mulf %0, %9 : vector<8x128xf32>
    %c0_3 = arith.constant 0 : index
    %c0_4 = arith.constant 0 : index
    %11 = vector.load %arg2[%c0_3, %c0_4] : memref<1x128xf32, #tpu.memory_space<vmem>>, vector<1x128xf32>
    %12 = vector.broadcast %11 : vector<1x128xf32> to vector<8x128xf32>
    %13 = arith.mulf %10, %12 : vector<8x128xf32>
    %c0_5 = arith.constant 0 : index
    %c0_6 = arith.constant 0 : index
    %14 = vector.load %arg3[%c0_5, %c0_6] : memref<128x128xf32, #tpu.memory_space<vmem>>, vector<128x128xf32>
    %cst_7 = arith.constant dense<0.000000e+00> : vector<8x128xf32>
    %15 = tpu.matmul %13, %14, %cst_7 {dimension_numbers = #tpu.dot_dimension_numbers<[1], [0], [0], [1], [0, 0, 1, 1], [], []>} : vector<8x128xf32>, vector<128x128xf32>, vector<8x128xf32> -> vector<8x128xf32>
    %c0_8 = arith.constant 0 : index
    %c0_9 = arith.constant 0 : index
    %16 = vector.load %arg4[%c0_8, %c0_9] : memref<128x64xf32, #tpu.memory_space<vmem>>, vector<128x64xf32>
    %cst_10 = arith.constant dense<0.000000e+00> : vector<8x64xf32>
    %17 = tpu.matmul %13, %16, %cst_10 {dimension_numbers = #tpu.dot_dimension_numbers<[1], [0], [0], [1], [0, 0, 1, 1], [], []>} : vector<8x128xf32>, vector<128x64xf32>, vector<8x64xf32> -> vector<8x64xf32>
    %c0_11 = arith.constant 0 : index
    %c0_12 = arith.constant 0 : index
    %18 = vector.load %arg5[%c0_11, %c0_12] : memref<128x64xf32, #tpu.memory_space<vmem>>, vector<128x64xf32>
    %cst_13 = arith.constant dense<0.000000e+00> : vector<8x64xf32>
    %19 = tpu.matmul %13, %18, %cst_13 {dimension_numbers = #tpu.dot_dimension_numbers<[1], [0], [0], [1], [0, 0, 1, 1], [], []>} : vector<8x128xf32>, vector<128x64xf32>, vector<8x64xf32> -> vector<8x64xf32>
    %c0_14 = arith.constant 0 : index
    %c0_15 = arith.constant 0 : index
    %20 = vector.load %arg6[%c0_14, %c0_15] : memref<8x32xf32, #tpu.memory_space<vmem>>, vector<8x32xf32>
    %c0_16 = arith.constant 0 : index
    %c0_17 = arith.constant 0 : index
    %21 = vector.load %arg7[%c0_16, %c0_17] : memref<8x32xf32, #tpu.memory_space<vmem>>, vector<8x32xf32>
    %22 = vector.extract_strided_slice %15 {offsets = [0, 0], sizes = [8, 32], strides = [1, 1]} : vector<8x128xf32> to vector<8x32xf32>
    %23 = vector.extract_strided_slice %22 {offsets = [0, 16], sizes = [8, 16], strides = [1, 1]} : vector<8x32xf32> to vector<8x16xf32>
    %cst_18 = arith.constant 0.000000e+00 : f32
    %24 = vector.broadcast %cst_18 : f32 to vector<8x16xf32>
    %25 = arith.subf %24, %23 : vector<8x16xf32>
    %26 = vector.extract_strided_slice %22 {offsets = [0, 0], sizes = [8, 16], strides = [1, 1]} : vector<8x32xf32> to vector<8x16xf32>
    %27 = tpu.concatenate %25, %26 in 1 : vector<8x16xf32>, vector<8x16xf32> -> vector<8x32xf32>
    %28 = arith.mulf %22, %20 : vector<8x32xf32>
    %29 = arith.mulf %27, %21 : vector<8x32xf32>
    %30 = arith.addf %28, %29 : vector<8x32xf32>
    %31 = vector.extract_strided_slice %15 {offsets = [0, 32], sizes = [8, 32], strides = [1, 1]} : vector<8x128xf32> to vector<8x32xf32>
    %32 = vector.extract_strided_slice %31 {offsets = [0, 16], sizes = [8, 16], strides = [1, 1]} : vector<8x32xf32> to vector<8x16xf32>
    %cst_19 = arith.constant 0.000000e+00 : f32
    %33 = vector.broadcast %cst_19 : f32 to vector<8x16xf32>
    %34 = arith.subf %33, %32 : vector<8x16xf32>
    %35 = vector.extract_strided_slice %31 {offsets = [0, 0], sizes = [8, 16], strides = [1, 1]} : vector<8x32xf32> to vector<8x16xf32>
    %36 = tpu.concatenate %34, %35 in 1 : vector<8x16xf32>, vector<8x16xf32> -> vector<8x32xf32>
    %37 = arith.mulf %31, %20 : vector<8x32xf32>
    %38 = arith.mulf %36, %21 : vector<8x32xf32>
    %39 = arith.addf %37, %38 : vector<8x32xf32>
    %40 = vector.extract_strided_slice %15 {offsets = [0, 64], sizes = [8, 32], strides = [1, 1]} : vector<8x128xf32> to vector<8x32xf32>
    %41 = vector.extract_strided_slice %40 {offsets = [0, 16], sizes = [8, 16], strides = [1, 1]} : vector<8x32xf32> to vector<8x16xf32>
    %cst_20 = arith.constant 0.000000e+00 : f32
    %42 = vector.broadcast %cst_20 : f32 to vector<8x16xf32>
    %43 = arith.subf %42, %41 : vector<8x16xf32>
    %44 = vector.extract_strided_slice %40 {offsets = [0, 0], sizes = [8, 16], strides = [1, 1]} : vector<8x32xf32> to vector<8x16xf32>
    %45 = tpu.concatenate %43, %44 in 1 : vector<8x16xf32>, vector<8x16xf32> -> vector<8x32xf32>
    %46 = arith.mulf %40, %20 : vector<8x32xf32>
    %47 = arith.mulf %45, %21 : vector<8x32xf32>
    %48 = arith.addf %46, %47 : vector<8x32xf32>
    %49 = vector.extract_strided_slice %15 {offsets = [0, 96], sizes = [8, 32], strides = [1, 1]} : vector<8x128xf32> to vector<8x32xf32>
    %50 = vector.extract_strided_slice %49 {offsets = [0, 16], sizes = [8, 16], strides = [1, 1]} : vector<8x32xf32> to vector<8x16xf32>
    %cst_21 = arith.constant 0.000000e+00 : f32
    %51 = vector.broadcast %cst_21 : f32 to vector<8x16xf32>
    %52 = arith.subf %51, %50 : vector<8x16xf32>
    %53 = vector.extract_strided_slice %49 {offsets = [0, 0], sizes = [8, 16], strides = [1, 1]} : vector<8x32xf32> to vector<8x16xf32>
    %54 = tpu.concatenate %52, %53 in 1 : vector<8x16xf32>, vector<8x16xf32> -> vector<8x32xf32>
    %55 = arith.mulf %49, %20 : vector<8x32xf32>
    %56 = arith.mulf %54, %21 : vector<8x32xf32>
    %57 = arith.addf %55, %56 : vector<8x32xf32>
    %58 = tpu.concatenate %30, %39, %48, %57 in 1 : vector<8x32xf32>, vector<8x32xf32>, vector<8x32xf32>, vector<8x32xf32> -> vector<8x128xf32>
    %c0_22 = arith.constant 0 : index
    %c0_23 = arith.constant 0 : index
    %59 = vector.load %arg8[%c0_22, %c0_23] : memref<8x128xf32, #tpu.memory_space<vmem>>, vector<8x128xf32>
    tpu.vector_store %arg8[%c0_22, %c0_23], %58 {strides = array<i32>} : memref<8x128xf32, #tpu.memory_space<vmem>>, vector<8x128xf32>,
    %60 = vector.extract_strided_slice %17 {offsets = [0, 0], sizes = [8, 32], strides = [1, 1]} : vector<8x64xf32> to vector<8x32xf32>
    %61 = vector.extract_strided_slice %60 {offsets = [0, 16], sizes = [8, 16], strides = [1, 1]} : vector<8x32xf32> to vector<8x16xf32>
    %cst_24 = arith.constant 0.000000e+00 : f32
    %62 = vector.broadcast %cst_24 : f32 to vector<8x16xf32>
    %63 = arith.subf %62, %61 : vector<8x16xf32>
    %64 = vector.extract_strided_slice %60 {offsets = [0, 0], sizes = [8, 16], strides = [1, 1]} : vector<8x32xf32> to vector<8x16xf32>
    %65 = tpu.concatenate %63, %64 in 1 : vector<8x16xf32>, vector<8x16xf32> -> vector<8x32xf32>
    %66 = arith.mulf %60, %20 : vector<8x32xf32>
    %67 = arith.mulf %65, %21 : vector<8x32xf32>
    %68 = arith.addf %66, %67 : vector<8x32xf32>
    %69 = vector.extract_strided_slice %17 {offsets = [0, 32], sizes = [8, 32], strides = [1, 1]} : vector<8x64xf32> to vector<8x32xf32>
    %70 = vector.extract_strided_slice %69 {offsets = [0, 16], sizes = [8, 16], strides = [1, 1]} : vector<8x32xf32> to vector<8x16xf32>
    %cst_25 = arith.constant 0.000000e+00 : f32
    %71 = vector.broadcast %cst_25 : f32 to vector<8x16xf32>
    %72 = arith.subf %71, %70 : vector<8x16xf32>
    %73 = vector.extract_strided_slice %69 {offsets = [0, 0], sizes = [8, 16], strides = [1, 1]} : vector<8x32xf32> to vector<8x16xf32>
    %74 = tpu.concatenate %72, %73 in 1 : vector<8x16xf32>, vector<8x16xf32> -> vector<8x32xf32>
    %75 = arith.mulf %69, %20 : vector<8x32xf32>
    %76 = arith.mulf %74, %21 : vector<8x32xf32>
    %77 = arith.addf %75, %76 : vector<8x32xf32>
    %78 = tpu.concatenate %68, %77 in 1 : vector<8x32xf32>, vector<8x32xf32> -> vector<8x64xf32>
    %c0_26 = arith.constant 0 : index
    %c0_27 = arith.constant 0 : index
    %79 = vector.load %arg9[%c0_26, %c0_27] : memref<8x64xf32, #tpu.memory_space<vmem>>, vector<8x64xf32>
    tpu.vector_store %arg9[%c0_26, %c0_27], %78 {strides = array<i32>} : memref<8x64xf32, #tpu.memory_space<vmem>>, vector<8x64xf32>,
    %c0_28 = arith.constant 0 : index
    %c0_29 = arith.constant 0 : index
    %80 = vector.load %arg10[%c0_28, %c0_29] : memref<8x64xf32, #tpu.memory_space<vmem>>, vector<8x64xf32>
    tpu.vector_store %arg10[%c0_28, %c0_29], %19 {strides = array<i32>} : memref<8x64xf32, #tpu.memory_space<vmem>>, vector<8x64xf32>,
    return
  }
  func.func @transform_0(%arg0: i32) -> (i32, i32) {
    %c0_i32 = arith.constant 0 : i32
    %c0_i32_0 = arith.constant 0 : i32
    return %arg0, %c0_i32 : i32, i32
  }
  func.func @transform_1(%arg0: i32) -> (i32, i32) {
    %c0_i32 = arith.constant 0 : i32
    %c0_i32_0 = arith.constant 0 : i32
    %c0_i32_1 = arith.constant 0 : i32
    return %c0_i32, %c0_i32_0 : i32, i32
  }
  func.func @transform_2(%arg0: i32) -> (i32, i32) {
    %c0_i32 = arith.constant 0 : i32
    %c0_i32_0 = arith.constant 0 : i32
    %c0_i32_1 = arith.constant 0 : i32
    return %c0_i32, %c0_i32_0 : i32, i32
  }
  func.func @transform_3(%arg0: i32) -> (i32, i32) {
    %c0_i32 = arith.constant 0 : i32
    %c0_i32_0 = arith.constant 0 : i32
    %c0_i32_1 = arith.constant 0 : i32
    return %c0_i32, %c0_i32_0 : i32, i32
  }
  func.func @transform_4(%arg0: i32) -> (i32, i32) {
    %c0_i32 = arith.constant 0 : i32
    %c0_i32_0 = arith.constant 0 : i32
    %c0_i32_1 = arith.constant 0 : i32
    return %c0_i32, %c0_i32_0 : i32, i32
  }
  func.func @transform_5(%arg0: i32) -> (i32, i32) {
    %c0_i32 = arith.constant 0 : i32
    %c0_i32_0 = arith.constant 0 : i32
    %c0_i32_1 = arith.constant 0 : i32
    return %c0_i32, %c0_i32_0 : i32, i32
  }
  func.func @transform_6(%arg0: i32) -> (i32, i32) {
    %c0_i32 = arith.constant 0 : i32
    %c0_i32_0 = arith.constant 0 : i32
    %c0_i32_1 = arith.constant 0 : i32
    return %c0_i32, %c0_i32_0 : i32, i32
  }
  func.func @transform_7(%arg0: i32) -> (i32, i32) {
    %c0_i32 = arith.constant 0 : i32
    %c0_i32_0 = arith.constant 0 : i32
    return %arg0, %c0_i32 : i32, i32
  }
  func.func @transform_8(%arg0: i32) -> (i32, i32) {
    %c0_i32 = arith.constant 0 : i32
    %c0_i32_0 = arith.constant 0 : i32
    return %arg0, %c0_i32 : i32, i32
  }
  func.func @transform_9(%arg0: i32) -> (i32, i32) {
    %c0_i32 = arith.constant 0 : i32
    %c0_i32_0 = arith.constant 0 : i32
    return %arg0, %c0_i32 : i32, i32
  }
}

module attributes {stable_mosaic.version = 11 : i64} {
  func.func @_ln_mlp_res_kernel(%arg0: i32, %arg1: memref<8x128xf32, #tpu.memory_space<vmem>>, %arg2: memref<1x128xf32, #tpu.memory_space<vmem>>, %arg3: memref<128x256xf32, #tpu.memory_space<vmem>>, %arg4: memref<128x256xf32, #tpu.memory_space<vmem>>, %arg5: memref<256x128xf32, #tpu.memory_space<vmem>>, %arg6: memref<8x128xf32, #tpu.memory_space<vmem>>) attributes {dimension_semantics = [#tpu.dimension_semantics<parallel>], iteration_bounds = array<i64: 2>, scalar_prefetch = 0 : i64, scratch_operands = 0 : i64, tpu.core_type = #tpu.core_type<tc>, window_params = [{transform_indices = @transform_0, window_bounds = array<i64: 8, 128>}, {pipeline_mode = #tpu.pipeline_mode<synchronous>, transform_indices = @transform_1, window_bounds = array<i64: 1, 128>}, {pipeline_mode = #tpu.pipeline_mode<synchronous>, transform_indices = @transform_2, window_bounds = array<i64: 128, 256>}, {pipeline_mode = #tpu.pipeline_mode<synchronous>, transform_indices = @transform_3, window_bounds = array<i64: 128, 256>}, {pipeline_mode = #tpu.pipeline_mode<synchronous>, transform_indices = @transform_4, window_bounds = array<i64: 256, 128>}, {transform_indices = @transform_5, window_bounds = array<i64: 8, 128>}]} {
    %c0 = arith.constant 0 : index
    %c0_0 = arith.constant 0 : index
    %0 = vector.load %arg1[%c0, %c0_0] : memref<8x128xf32, #tpu.memory_space<vmem>>, vector<8x128xf32>
    %1 = arith.mulf %0, %0 : vector<8x128xf32>
    %cst = arith.constant dense<0.000000e+00> : vector<8xf32>
    %2 = vector.multi_reduction <add>, %1, %cst [1] : vector<8x128xf32> to vector<8xf32>
    %3 = vector.shape_cast %2 : vector<8xf32> to vector<8x1xf32>
    %cst_1 = arith.constant 1.280000e+02 : f32
    %4 = vector.broadcast %cst_1 : f32 to vector<8x1xf32>
    %5 = arith.divf %3, %4 : vector<8x1xf32>
    %cst_2 = arith.constant 9.99999997E-7 : f32
    %6 = vector.broadcast %cst_2 : f32 to vector<8x1xf32>
    %7 = arith.addf %5, %6 : vector<8x1xf32>
    %8 = math.rsqrt %7 : vector<8x1xf32>
    %9 = vector.broadcast %8 : vector<8x1xf32> to vector<8x128xf32>
    %10 = arith.mulf %0, %9 : vector<8x128xf32>
    %c0_3 = arith.constant 0 : index
    %c0_4 = arith.constant 0 : index
    %11 = vector.load %arg2[%c0_3, %c0_4] : memref<1x128xf32, #tpu.memory_space<vmem>>, vector<1x128xf32>
    %12 = vector.broadcast %11 : vector<1x128xf32> to vector<8x128xf32>
    %13 = arith.mulf %10, %12 : vector<8x128xf32>
    %c0_5 = arith.constant 0 : index
    %c0_6 = arith.constant 0 : index
    %14 = vector.load %arg3[%c0_5, %c0_6] : memref<128x256xf32, #tpu.memory_space<vmem>>, vector<128x256xf32>
    %cst_7 = arith.constant dense<0.000000e+00> : vector<8x256xf32>
    %15 = tpu.matmul %13, %14, %cst_7 {dimension_numbers = #tpu.dot_dimension_numbers<[1], [0], [0], [1], [0, 0, 1, 1], [], []>} : vector<8x128xf32>, vector<128x256xf32>, vector<8x256xf32> -> vector<8x256xf32>
    %c0_8 = arith.constant 0 : index
    %c0_9 = arith.constant 0 : index
    %16 = vector.load %arg4[%c0_8, %c0_9] : memref<128x256xf32, #tpu.memory_space<vmem>>, vector<128x256xf32>
    %cst_10 = arith.constant dense<0.000000e+00> : vector<8x256xf32>
    %17 = tpu.matmul %13, %16, %cst_10 {dimension_numbers = #tpu.dot_dimension_numbers<[1], [0], [0], [1], [0, 0, 1, 1], [], []>} : vector<8x128xf32>, vector<128x256xf32>, vector<8x256xf32> -> vector<8x256xf32>
    %18 = arith.negf %15 : vector<8x256xf32>
    %19 = math.exp %18 : vector<8x256xf32>
    %cst_11 = arith.constant 1.000000e+00 : f32
    %20 = vector.broadcast %cst_11 : f32 to vector<8x256xf32>
    %21 = arith.addf %20, %19 : vector<8x256xf32>
    %22 = arith.divf %20, %21 : vector<8x256xf32>
    %23 = arith.mulf %15, %22 : vector<8x256xf32>
    %24 = arith.mulf %23, %17 : vector<8x256xf32>
    %c0_12 = arith.constant 0 : index
    %c0_13 = arith.constant 0 : index
    %25 = vector.load %arg5[%c0_12, %c0_13] : memref<256x128xf32, #tpu.memory_space<vmem>>, vector<256x128xf32>
    %cst_14 = arith.constant dense<0.000000e+00> : vector<8x128xf32>
    %26 = tpu.matmul %24, %25, %cst_14 {dimension_numbers = #tpu.dot_dimension_numbers<[1], [0], [0], [1], [0, 0, 1, 1], [], []>} : vector<8x256xf32>, vector<256x128xf32>, vector<8x128xf32> -> vector<8x128xf32>
    %27 = arith.addf %26, %0 : vector<8x128xf32>
    %c0_15 = arith.constant 0 : index
    %c0_16 = arith.constant 0 : index
    %28 = vector.load %arg6[%c0_15, %c0_16] : memref<8x128xf32, #tpu.memory_space<vmem>>, vector<8x128xf32>
    tpu.vector_store %arg6[%c0_15, %c0_16], %27 {strides = array<i32>} : memref<8x128xf32, #tpu.memory_space<vmem>>, vector<8x128xf32>,
    return
  }
  func.func @transform_0(%arg0: i32) -> (i32, i32) {
    %c0_i32 = arith.constant 0 : i32
    %c0_i32_0 = arith.constant 0 : i32
    return %arg0, %c0_i32 : i32, i32
  }
  func.func @transform_1(%arg0: i32) -> (i32, i32) {
    %c0_i32 = arith.constant 0 : i32
    %c0_i32_0 = arith.constant 0 : i32
    %c0_i32_1 = arith.constant 0 : i32
    return %c0_i32, %c0_i32_0 : i32, i32
  }
  func.func @transform_2(%arg0: i32) -> (i32, i32) {
    %c0_i32 = arith.constant 0 : i32
    %c0_i32_0 = arith.constant 0 : i32
    %c0_i32_1 = arith.constant 0 : i32
    return %c0_i32, %c0_i32_0 : i32, i32
  }
  func.func @transform_3(%arg0: i32) -> (i32, i32) {
    %c0_i32 = arith.constant 0 : i32
    %c0_i32_0 = arith.constant 0 : i32
    %c0_i32_1 = arith.constant 0 : i32
    return %c0_i32, %c0_i32_0 : i32, i32
  }
  func.func @transform_4(%arg0: i32) -> (i32, i32) {
    %c0_i32 = arith.constant 0 : i32
    %c0_i32_0 = arith.constant 0 : i32
    %c0_i32_1 = arith.constant 0 : i32
    return %c0_i32, %c0_i32_0 : i32, i32
  }
  func.func @transform_5(%arg0: i32) -> (i32, i32) {
    %c0_i32 = arith.constant 0 : i32
    %c0_i32_0 = arith.constant 0 : i32
    return %arg0, %c0_i32 : i32, i32
  }
}

module attributes {stable_mosaic.version = 11 : i64} {
  func.func @_attn_oproj_kernel(%arg0: i32, %arg1: memref<8x128xf32, #tpu.memory_space<vmem>>, %arg2: memref<8x64xf32, #tpu.memory_space<vmem>>, %arg3: memref<8x64xf32, #tpu.memory_space<vmem>>, %arg4: memref<128x128xf32, #tpu.memory_space<vmem>>, %arg5: memref<8x128xf32, #tpu.memory_space<vmem>>, %arg6: memref<8x128xf32, #tpu.memory_space<vmem>>) attributes {dimension_semantics = [#tpu.dimension_semantics<parallel>], iteration_bounds = array<i64: 2>, scalar_prefetch = 0 : i64, scratch_operands = 0 : i64, tpu.core_type = #tpu.core_type<tc>, window_params = [{transform_indices = @transform_0, window_bounds = array<i64: 8, 128>}, {transform_indices = @transform_1, window_bounds = array<i64: 8, 64>}, {transform_indices = @transform_2, window_bounds = array<i64: 8, 64>}, {pipeline_mode = #tpu.pipeline_mode<synchronous>, transform_indices = @transform_3, window_bounds = array<i64: 128, 128>}, {transform_indices = @transform_4, window_bounds = array<i64: 8, 128>}, {transform_indices = @transform_5, window_bounds = array<i64: 8, 128>}]} {
    %c0 = arith.constant 0 : index
    %c0_0 = arith.constant 0 : index
    %0 = vector.load %arg1[%c0, %c0_0] : memref<8x128xf32, #tpu.memory_space<vmem>>, vector<8x128xf32>
    %c0_1 = arith.constant 0 : index
    %c0_2 = arith.constant 0 : index
    %1 = vector.load %arg2[%c0_1, %c0_2] : memref<8x64xf32, #tpu.memory_space<vmem>>, vector<8x64xf32>
    %c0_3 = arith.constant 0 : index
    %c0_4 = arith.constant 0 : index
    %2 = vector.load %arg3[%c0_3, %c0_4] : memref<8x64xf32, #tpu.memory_space<vmem>>, vector<8x64xf32>
    %c0_5 = arith.constant 0 : index
    %c0_6 = arith.constant 0 : index
    %3 = vector.load %arg5[%c0_5, %c0_6] : memref<8x128xf32, #tpu.memory_space<vmem>>, vector<8x128xf32>
    %4 = tpu.iota {dimensions = array<i32: 0>} : vector<8x8xi32>
    %5 = tpu.iota {dimensions = array<i32: 1>} : vector<8x8xi32>
    %6 = arith.cmpi sle, %5, %4 : vector<8x8xi32>
    %7 = vector.extract_strided_slice %0 {offsets = [0, 0], sizes = [8, 32], strides = [1, 1]} : vector<8x128xf32> to vector<8x32xf32>
    %8 = vector.extract_strided_slice %1 {offsets = [0, 0], sizes = [8, 32], strides = [1, 1]} : vector<8x64xf32> to vector<8x32xf32>
    %9 = vector.extract_strided_slice %2 {offsets = [0, 0], sizes = [8, 32], strides = [1, 1]} : vector<8x64xf32> to vector<8x32xf32>
    %cst = arith.constant dense<0.000000e+00> : vector<8x8xf32>
    %10 = tpu.matmul %7, %8, %cst {dimension_numbers = #tpu.dot_dimension_numbers<[1], [1], [0], [0], [0, 0, 1, 0], [], []>} : vector<8x32xf32>, vector<8x32xf32>, vector<8x8xf32> -> vector<8x8xf32>
    %cst_7 = arith.constant 0.176776692 : f32
    %11 = vector.broadcast %cst_7 : f32 to vector<8x8xf32>
    %12 = arith.mulf %10, %11 : vector<8x8xf32>
    %cst_8 = arith.constant -1.000000e+30 : f32
    %13 = vector.broadcast %cst_8 : f32 to vector<8x8xf32>
    %14 = arith.select %6, %12, %13 : vector<8x8xi1>, vector<8x8xf32>
    %cst_9 = arith.constant dense<0xFF800000> : vector<8xf32>
    %15 = vector.multi_reduction <maximumf>, %14, %cst_9 [1] : vector<8x8xf32> to vector<8xf32>
    %16 = vector.shape_cast %15 : vector<8xf32> to vector<8x1xf32>
    %17 = vector.broadcast %16 : vector<8x1xf32> to vector<8x8xf32>
    %18 = arith.subf %14, %17 : vector<8x8xf32>
    %19 = math.exp %18 : vector<8x8xf32>
    %cst_10 = arith.constant dense<0.000000e+00> : vector<8xf32>
    %20 = vector.multi_reduction <add>, %19, %cst_10 [1] : vector<8x8xf32> to vector<8xf32>
    %21 = vector.shape_cast %20 : vector<8xf32> to vector<8x1xf32>
    %22 = vector.broadcast %21 : vector<8x1xf32> to vector<8x8xf32>
    %23 = arith.divf %19, %22 : vector<8x8xf32>
    %cst_11 = arith.constant dense<0.000000e+00> : vector<8x32xf32>
    %24 = tpu.matmul %23, %9, %cst_11 {dimension_numbers = #tpu.dot_dimension_numbers<[1], [0], [0], [1], [0, 0, 1, 1], [], []>} : vector<8x8xf32>, vector<8x32xf32>, vector<8x32xf32> -> vector<8x32xf32>
    %25 = vector.extract_strided_slice %0 {offsets = [0, 32], sizes = [8, 32], strides = [1, 1]} : vector<8x128xf32> to vector<8x32xf32>
    %26 = vector.extract_strided_slice %1 {offsets = [0, 0], sizes = [8, 32], strides = [1, 1]} : vector<8x64xf32> to vector<8x32xf32>
    %27 = vector.extract_strided_slice %2 {offsets = [0, 0], sizes = [8, 32], strides = [1, 1]} : vector<8x64xf32> to vector<8x32xf32>
    %cst_12 = arith.constant dense<0.000000e+00> : vector<8x8xf32>
    %28 = tpu.matmul %25, %26, %cst_12 {dimension_numbers = #tpu.dot_dimension_numbers<[1], [1], [0], [0], [0, 0, 1, 0], [], []>} : vector<8x32xf32>, vector<8x32xf32>, vector<8x8xf32> -> vector<8x8xf32>
    %cst_13 = arith.constant 0.176776692 : f32
    %29 = vector.broadcast %cst_13 : f32 to vector<8x8xf32>
    %30 = arith.mulf %28, %29 : vector<8x8xf32>
    %cst_14 = arith.constant -1.000000e+30 : f32
    %31 = vector.broadcast %cst_14 : f32 to vector<8x8xf32>
    %32 = arith.select %6, %30, %31 : vector<8x8xi1>, vector<8x8xf32>
    %cst_15 = arith.constant dense<0xFF800000> : vector<8xf32>
    %33 = vector.multi_reduction <maximumf>, %32, %cst_15 [1] : vector<8x8xf32> to vector<8xf32>
    %34 = vector.shape_cast %33 : vector<8xf32> to vector<8x1xf32>
    %35 = vector.broadcast %34 : vector<8x1xf32> to vector<8x8xf32>
    %36 = arith.subf %32, %35 : vector<8x8xf32>
    %37 = math.exp %36 : vector<8x8xf32>
    %cst_16 = arith.constant dense<0.000000e+00> : vector<8xf32>
    %38 = vector.multi_reduction <add>, %37, %cst_16 [1] : vector<8x8xf32> to vector<8xf32>
    %39 = vector.shape_cast %38 : vector<8xf32> to vector<8x1xf32>
    %40 = vector.broadcast %39 : vector<8x1xf32> to vector<8x8xf32>
    %41 = arith.divf %37, %40 : vector<8x8xf32>
    %cst_17 = arith.constant dense<0.000000e+00> : vector<8x32xf32>
    %42 = tpu.matmul %41, %27, %cst_17 {dimension_numbers = #tpu.dot_dimension_numbers<[1], [0], [0], [1], [0, 0, 1, 1], [], []>} : vector<8x8xf32>, vector<8x32xf32>, vector<8x32xf32> -> vector<8x32xf32>
    %43 = vector.extract_strided_slice %0 {offsets = [0, 64], sizes = [8, 32], strides = [1, 1]} : vector<8x128xf32> to vector<8x32xf32>
    %44 = vector.extract_strided_slice %1 {offsets = [0, 32], sizes = [8, 32], strides = [1, 1]} : vector<8x64xf32> to vector<8x32xf32>
    %45 = vector.extract_strided_slice %2 {offsets = [0, 32], sizes = [8, 32], strides = [1, 1]} : vector<8x64xf32> to vector<8x32xf32>
    %cst_18 = arith.constant dense<0.000000e+00> : vector<8x8xf32>
    %46 = tpu.matmul %43, %44, %cst_18 {dimension_numbers = #tpu.dot_dimension_numbers<[1], [1], [0], [0], [0, 0, 1, 0], [], []>} : vector<8x32xf32>, vector<8x32xf32>, vector<8x8xf32> -> vector<8x8xf32>
    %cst_19 = arith.constant 0.176776692 : f32
    %47 = vector.broadcast %cst_19 : f32 to vector<8x8xf32>
    %48 = arith.mulf %46, %47 : vector<8x8xf32>
    %cst_20 = arith.constant -1.000000e+30 : f32
    %49 = vector.broadcast %cst_20 : f32 to vector<8x8xf32>
    %50 = arith.select %6, %48, %49 : vector<8x8xi1>, vector<8x8xf32>
    %cst_21 = arith.constant dense<0xFF800000> : vector<8xf32>
    %51 = vector.multi_reduction <maximumf>, %50, %cst_21 [1] : vector<8x8xf32> to vector<8xf32>
    %52 = vector.shape_cast %51 : vector<8xf32> to vector<8x1xf32>
    %53 = vector.broadcast %52 : vector<8x1xf32> to vector<8x8xf32>
    %54 = arith.subf %50, %53 : vector<8x8xf32>
    %55 = math.exp %54 : vector<8x8xf32>
    %cst_22 = arith.constant dense<0.000000e+00> : vector<8xf32>
    %56 = vector.multi_reduction <add>, %55, %cst_22 [1] : vector<8x8xf32> to vector<8xf32>
    %57 = vector.shape_cast %56 : vector<8xf32> to vector<8x1xf32>
    %58 = vector.broadcast %57 : vector<8x1xf32> to vector<8x8xf32>
    %59 = arith.divf %55, %58 : vector<8x8xf32>
    %cst_23 = arith.constant dense<0.000000e+00> : vector<8x32xf32>
    %60 = tpu.matmul %59, %45, %cst_23 {dimension_numbers = #tpu.dot_dimension_numbers<[1], [0], [0], [1], [0, 0, 1, 1], [], []>} : vector<8x8xf32>, vector<8x32xf32>, vector<8x32xf32> -> vector<8x32xf32>
    %61 = vector.extract_strided_slice %0 {offsets = [0, 96], sizes = [8, 32], strides = [1, 1]} : vector<8x128xf32> to vector<8x32xf32>
    %62 = vector.extract_strided_slice %1 {offsets = [0, 32], sizes = [8, 32], strides = [1, 1]} : vector<8x64xf32> to vector<8x32xf32>
    %63 = vector.extract_strided_slice %2 {offsets = [0, 32], sizes = [8, 32], strides = [1, 1]} : vector<8x64xf32> to vector<8x32xf32>
    %cst_24 = arith.constant dense<0.000000e+00> : vector<8x8xf32>
    %64 = tpu.matmul %61, %62, %cst_24 {dimension_numbers = #tpu.dot_dimension_numbers<[1], [1], [0], [0], [0, 0, 1, 0], [], []>} : vector<8x32xf32>, vector<8x32xf32>, vector<8x8xf32> -> vector<8x8xf32>
    %cst_25 = arith.constant 0.176776692 : f32
    %65 = vector.broadcast %cst_25 : f32 to vector<8x8xf32>
    %66 = arith.mulf %64, %65 : vector<8x8xf32>
    %cst_26 = arith.constant -1.000000e+30 : f32
    %67 = vector.broadcast %cst_26 : f32 to vector<8x8xf32>
    %68 = arith.select %6, %66, %67 : vector<8x8xi1>, vector<8x8xf32>
    %cst_27 = arith.constant dense<0xFF800000> : vector<8xf32>
    %69 = vector.multi_reduction <maximumf>, %68, %cst_27 [1] : vector<8x8xf32> to vector<8xf32>
    %70 = vector.shape_cast %69 : vector<8xf32> to vector<8x1xf32>
    %71 = vector.broadcast %70 : vector<8x1xf32> to vector<8x8xf32>
    %72 = arith.subf %68, %71 : vector<8x8xf32>
    %73 = math.exp %72 : vector<8x8xf32>
    %cst_28 = arith.constant dense<0.000000e+00> : vector<8xf32>
    %74 = vector.multi_reduction <add>, %73, %cst_28 [1] : vector<8x8xf32> to vector<8xf32>
    %75 = vector.shape_cast %74 : vector<8xf32> to vector<8x1xf32>
    %76 = vector.broadcast %75 : vector<8x1xf32> to vector<8x8xf32>
    %77 = arith.divf %73, %76 : vector<8x8xf32>
    %cst_29 = arith.constant dense<0.000000e+00> : vector<8x32xf32>
    %78 = tpu.matmul %77, %63, %cst_29 {dimension_numbers = #tpu.dot_dimension_numbers<[1], [0], [0], [1], [0, 0, 1, 1], [], []>} : vector<8x8xf32>, vector<8x32xf32>, vector<8x32xf32> -> vector<8x32xf32>
    %79 = tpu.concatenate %24, %42, %60, %78 in 1 : vector<8x32xf32>, vector<8x32xf32>, vector<8x32xf32>, vector<8x32xf32> -> vector<8x128xf32>
    %c0_30 = arith.constant 0 : index
    %c0_31 = arith.constant 0 : index
    %80 = vector.load %arg4[%c0_30, %c0_31] : memref<128x128xf32, #tpu.memory_space<vmem>>, vector<128x128xf32>
    %cst_32 = arith.constant dense<0.000000e+00> : vector<8x128xf32>
    %81 = tpu.matmul %79, %80, %cst_32 {dimension_numbers = #tpu.dot_dimension_numbers<[1], [0], [0], [1], [0, 0, 1, 1], [], []>} : vector<8x128xf32>, vector<128x128xf32>, vector<8x128xf32> -> vector<8x128xf32>
    %82 = arith.addf %81, %3 : vector<8x128xf32>
    %c0_33 = arith.constant 0 : index
    %c0_34 = arith.constant 0 : index
    %83 = vector.load %arg6[%c0_33, %c0_34] : memref<8x128xf32, #tpu.memory_space<vmem>>, vector<8x128xf32>
    tpu.vector_store %arg6[%c0_33, %c0_34], %82 {strides = array<i32>} : memref<8x128xf32, #tpu.memory_space<vmem>>, vector<8x128xf32>,
    return
  }
  func.func @transform_0(%arg0: i32) -> (i32, i32) {
    %c0_i32 = arith.constant 0 : i32
    %c0_i32_0 = arith.constant 0 : i32
    return %arg0, %c0_i32 : i32, i32
  }
  func.func @transform_1(%arg0: i32) -> (i32, i32) {
    %c0_i32 = arith.constant 0 : i32
    %c0_i32_0 = arith.constant 0 : i32
    return %arg0, %c0_i32 : i32, i32
  }
  func.func @transform_2(%arg0: i32) -> (i32, i32) {
    %c0_i32 = arith.constant 0 : i32
    %c0_i32_0 = arith.constant 0 : i32
    return %arg0, %c0_i32 : i32, i32
  }
  func.func @transform_3(%arg0: i32) -> (i32, i32) {
    %c0_i32 = arith.constant 0 : i32
    %c0_i32_0 = arith.constant 0 : i32
    %c0_i32_1 = arith.constant 0 : i32
    return %c0_i32, %c0_i32_0 : i32, i32
  }
  func.func @transform_4(%arg0: i32) -> (i32, i32) {
    %c0_i32 = arith.constant 0 : i32
    %c0_i32_0 = arith.constant 0 : i32
    return %arg0, %c0_i32 : i32, i32
  }
  func.func @transform_5(%arg0: i32) -> (i32, i32) {
    %c0_i32 = arith.constant 0 : i32
    %c0_i32_0 = arith.constant 0 : i32
    return %arg0, %c0_i32 : i32, i32
  }
}

module attributes {stable_mosaic.version = 11 : i64} {
  func.func @_ln_lmhead_kernel(%arg0: i32, %arg1: i32, %arg2: memref<8x128xf32, #tpu.memory_space<vmem>>, %arg3: memref<1x128xf32, #tpu.memory_space<vmem>>, %arg4: memref<128x128xf32, #tpu.memory_space<vmem>>, %arg5: memref<8x128xf32, #tpu.memory_space<vmem>>) attributes {dimension_semantics = [#tpu.dimension_semantics<parallel>, #tpu.dimension_semantics<parallel>], iteration_bounds = array<i64: 2, 2>, scalar_prefetch = 0 : i64, scratch_operands = 0 : i64, tpu.core_type = #tpu.core_type<tc>, window_params = [{transform_indices = @transform_0, window_bounds = array<i64: 8, 128>}, {pipeline_mode = #tpu.pipeline_mode<synchronous>, transform_indices = @transform_1, window_bounds = array<i64: 1, 128>}, {transform_indices = @transform_2, window_bounds = array<i64: 128, 128>}, {transform_indices = @transform_3, window_bounds = array<i64: 8, 128>}]} {
    %c0 = arith.constant 0 : index
    %c0_0 = arith.constant 0 : index
    %0 = vector.load %arg2[%c0, %c0_0] : memref<8x128xf32, #tpu.memory_space<vmem>>, vector<8x128xf32>
    %1 = arith.mulf %0, %0 : vector<8x128xf32>
    %cst = arith.constant dense<0.000000e+00> : vector<8xf32>
    %2 = vector.multi_reduction <add>, %1, %cst [1] : vector<8x128xf32> to vector<8xf32>
    %3 = vector.shape_cast %2 : vector<8xf32> to vector<8x1xf32>
    %cst_1 = arith.constant 1.280000e+02 : f32
    %4 = vector.broadcast %cst_1 : f32 to vector<8x1xf32>
    %5 = arith.divf %3, %4 : vector<8x1xf32>
    %cst_2 = arith.constant 9.99999997E-7 : f32
    %6 = vector.broadcast %cst_2 : f32 to vector<8x1xf32>
    %7 = arith.addf %5, %6 : vector<8x1xf32>
    %8 = math.rsqrt %7 : vector<8x1xf32>
    %9 = vector.broadcast %8 : vector<8x1xf32> to vector<8x128xf32>
    %10 = arith.mulf %0, %9 : vector<8x128xf32>
    %c0_3 = arith.constant 0 : index
    %c0_4 = arith.constant 0 : index
    %11 = vector.load %arg3[%c0_3, %c0_4] : memref<1x128xf32, #tpu.memory_space<vmem>>, vector<1x128xf32>
    %12 = vector.broadcast %11 : vector<1x128xf32> to vector<8x128xf32>
    %13 = arith.mulf %10, %12 : vector<8x128xf32>
    %c0_5 = arith.constant 0 : index
    %c0_6 = arith.constant 0 : index
    %14 = vector.load %arg4[%c0_5, %c0_6] : memref<128x128xf32, #tpu.memory_space<vmem>>, vector<128x128xf32>
    %cst_7 = arith.constant dense<0.000000e+00> : vector<8x128xf32>
    %15 = tpu.matmul %13, %14, %cst_7 {dimension_numbers = #tpu.dot_dimension_numbers<[1], [0], [0], [1], [0, 0, 1, 1], [], []>} : vector<8x128xf32>, vector<128x128xf32>, vector<8x128xf32> -> vector<8x128xf32>
    %c0_8 = arith.constant 0 : index
    %c0_9 = arith.constant 0 : index
    %16 = vector.load %arg5[%c0_8, %c0_9] : memref<8x128xf32, #tpu.memory_space<vmem>>, vector<8x128xf32>
    tpu.vector_store %arg5[%c0_8, %c0_9], %15 {strides = array<i32>} : memref<8x128xf32, #tpu.memory_space<vmem>>, vector<8x128xf32>,
    return
  }
  func.func @transform_0(%arg0: i32, %arg1: i32) -> (i32, i32) {
    %c0_i32 = arith.constant 0 : i32
    %c0_i32_0 = arith.constant 0 : i32
    return %arg0, %c0_i32 : i32, i32
  }
  func.func @transform_1(%arg0: i32, %arg1: i32) -> (i32, i32) {
    %c0_i32 = arith.constant 0 : i32
    %c0_i32_0 = arith.constant 0 : i32
    %c0_i32_1 = arith.constant 0 : i32
    return %c0_i32, %c0_i32_0 : i32, i32
  }
  func.func @transform_2(%arg0: i32, %arg1: i32) -> (i32, i32) {
    %c0_i32 = arith.constant 0 : i32
    %c0_i32_0 = arith.constant 0 : i32
    return %c0_i32, %arg1 : i32, i32
  }
  func.func @transform_3(%arg0: i32, %arg1: i32) -> (i32, i32) {
    %c0_i32 = arith.constant 0 : i32
    return %arg0, %arg1 : i32, i32
  }
}

</mosaic_0001>

<bundles_post_ra>
// kernel: llama_forward.13
= control target key start
LH: loop header
LB: loop body
LE: loop exit
PB: predicated region body
PF: predicated region fallthrough
CT: control target
= control target key end

     0   :  { %8 = vsyncpa [#allocation4], 0  ;;  %s1006_s0 = inlined_call_operand.vmem [shape: f32[16,128], index: 0, kind: input, shape index: {}]   ;;  %s1007_s1 = inlined_call_operand.vmem [shape: f32[1,128], index: 1, kind: input, shape index: {}]   ;;  %s1008_s2 = inlined_call_operand.vmem [shape: f32[128,256], index: 2, kind: input, shape index: {}]   ;;  %s1009_s3 = inlined_call_operand.hbm [shape: f32[16,256], index: 3, kind: output, shape index: {}]  }
   0x1   :  { %10 = vsyncpa [#allocation4 + $0x1], 0  ;;  %s797_s12 = smov 0   ;;  %s799_s13 = smov 0  }
   0x2   :  { %s801_s14 = smov 0   ;;  %s803_s15 = smov 0  }
   0x3   :  { %s805_s16 = smov 0   ;;  %s807_s17 = smov 0  }
   0x4   :  { %s809_s18 = smov 0   ;;  %s811_s19 = smov 0  }
   0x5   :  { %s813_s20 = smov 0   ;;  %s815_s21 = smov 0  }
   0x6 LB: > { %s505_s22 = sadd.s32 4294967295, %s772_s21   ;;  %s506_s23 = sadd.s32 4294967294, %s772_s21   ;;  %s772_s21 = sphi %s815_s21, %s16_s21   ;;  %s768_s20 = sphi %s813_s20, %s1021_s20   ;;  %s764_s19 = sphi %s811_s19, %s1020_s19   ;;  %s760_s18 = sphi %s809_s18, %s1019_s18   ;;  %s756_s17 = sphi %s807_s17, %s1018_s17   ;;  %s752_s16 = sphi %s805_s16, %s1017_s16   ;;  %s748_s15 = sphi %s803_s15, %s1016_s15   ;;  %s744_s14 = sphi %s801_s14, %s1015_s14   ;;  %s740_s13 = sphi %s799_s13, %s1014_s13   ;;  %s736_s12 = sphi %s797_s12, %s1013_s12  }
   0x7   : > { %s25_s24 = sadd.s32 1, %s764_s19  ;;  %s28_s25 = sadd.s32 1, %s768_s20 }
   0x8   : > { %p26_p0 = scmp.ge.s32.totalorder %s25_s24, 2  ;;  %s82_s26 = sadd.s32 1, %s752_s16 }
   0x9   : > { %p89_p1 = scmp.ne.s32.totalorder %s752_s16, %s748_s15  ;;  %p90_p2 = scmp.eq.s32.totalorder %s772_s21, 0 }
   0xa   : > { %s1023_s24 = smov (%p26_p0, %s25_s24), 0  ;;  %s1025_s25 = smov (!%p26_p0, %s28_s25), %s768_s20 }
   0xb   : > { %s79_s27 = ssub.s32 %s764_s19, %s1023_s24  ;;  %p860_p3 = por %p90_p2, %p89_p1 }
   0xc   : > { %p30_p4 = scmp.ge.s32.totalorder %s1025_s25, 2  ;;  %p80_p5 = scmp.eq.s32.totalorder %s79_s27, 0 }
   0xd   : > { %s110_s29 = sadd.s32 1, %s744_s14  ;;  %p120_p6 = scmp.ne.s32.totalorder %s744_s14, %s740_s13 }
   0xe   : > { %s1027_s25 = smov (%p30_p4, %s1025_s25), 0  ;;  %p121_p7 = scmp.eq.s32.totalorder %s505_s22, 3 }
   0xf   : > { %s870_s30 = scalar_select %p80_p5, %s752_s16, %s82_s26  }
  0x10   : > { %s105_s4 = ssub.s32 %s768_s20, %s1027_s25  ;;  %p126_p8 = scmp.ne.s32.totalorder %s740_s13, %s736_s12 }
  0x11   : > { %s107_s5 = sor.u32 %s105_s4, %s79_s27  ;;  %p876_p10 = por %p121_p7, %p120_p6 }
  0x12   : > { %p108_p9 = scmp.eq.s32.totalorder %s107_s5, 0  ;;  %p127_p11 = scmp.eq.s32.totalorder %s506_s23, 3 }
  0x13   : > { %p508_p13 = scmp.ge.s32.totalorder %s772_s21, 4 }
  0x14   : > { %s881_s7 = scalar_select %p108_p9, %s744_s14, %s110_s29  }
  0x15   : > { %p883_p12 = por %p127_p11, %p126_p8  ;;  %146 = sbr.rel (%p508_p13) target bundleno = 38 (0x26), region = 20 }
  0x1a   : > { %156 = sbr.rel (!%p860_p3) target bundleno = 38 (0x26), region = 28  ;;  %s158_s9 = sand.u32 (%p860_p3), 1, %s752_s16  }
  0x1b   : > { %s510_s10 = sshll.u32 (%p860_p3), %s764_s19, 3  ;;  %s509_s11 = sshll.u32 (%p860_p3), %s158_s9, 7 }
  0x1c   : > { %s895_s23 = scalar_lea.vmem (%p860_p3), %s1008_s2, %s510_s10  ;;  %s160_s27 = scalar_lea.vmem (%p860_p3), [#allocation2], %s509_s11 }
  0x1d   : > { %v221_v0 = vld [vmem:[%s895_s23] sm:$0xff] (%p860_p3)  ;;  %v223_v1 = vld [vmem:[%s895_s23 + $0x10] sm:$0xff] (%p860_p3) }
  0x1e   : > { %v225_v2 = vld [vmem:[%s895_s23 + $0x20] sm:$0xff] (%p860_p3)  ;;  %222 = vst [vmem:[%s160_s27] sm:$0xff] (%p860_p3), %v221_v0  ;;  %224 = vst [vmem:[%s160_s27 + $0x8] sm:$0xff] (%p860_p3), %v223_v1  ;;  %v227_v3 = vld [vmem:[%s895_s23 + $0x30] sm:$0xff] (%p860_p3) }
  0x1f   : > { %226 = vst [vmem:[%s160_s27 + $0x10] sm:$0xff] %v225_v2  ;;  %v229_v4 = vld [vmem:[%s895_s23 + $0x40] sm:$0xff]  ;;  %v231_v5 = vld [vmem:[%s895_s23 + $0x50] sm:$0xff]  ;;  %228 = vst [vmem:[%s160_s27 + $0x18] sm:$0xff] %v227_v3 }
  0x20   : > { %230 = vst [vmem:[%s160_s27 + $0x20] sm:$0xff] %v229_v4  ;;  %232 = vst [vmem:[%s160_s27 + $0x28] sm:$0xff] %v231_v5  ;;  %v233_v6 = vld [vmem:[%s895_s23 + $0x60] sm:$0xff]  ;;  %v235_v7 = vld [vmem:[%s895_s23 + $0x70] sm:$0xff] }
  0x21   : > { %v237_v8 = vld [vmem:[%s895_s23 + $0x80] sm:$0xff]  ;;  %234 = vst [vmem:[%s160_s27 + $0x30] sm:$0xff] %v233_v6  ;;  %236 = vst [vmem:[%s160_s27 + $0x38] sm:$0xff] %v235_v7  ;;  %v239_v9 = vld [vmem:[%s895_s23 + $0x90] sm:$0xff] }
  0x22   : > { %238 = vst [vmem:[%s160_s27 + $0x40] sm:$0xff] %v237_v8  ;;  %v241_v10 = vld [vmem:[%s895_s23 + $0xa0] sm:$0xff]  ;;  %v243_v11 = vld [vmem:[%s895_s23 + $0xb0] sm:$0xff]  ;;  %240 = vst [vmem:[%s160_s27 + $0x48] sm:$0xff] %v239_v9 }
  0x23   : > { %242 = vst [vmem:[%s160_s27 + $0x50] sm:$0xff] %v241_v10  ;;  %244 = vst [vmem:[%s160_s27 + $0x58] sm:$0xff] %v243_v11  ;;  %v245_v12 = vld [vmem:[%s895_s23 + $0xc0] sm:$0xff]  ;;  %v247_v13 = vld [vmem:[%s895_s23 + $0xd0] sm:$0xff] }
  0x24   : > { %v249_v14 = vld [vmem:[%s895_s23 + $0xe0] sm:$0xff]  ;;  %246 = vst [vmem:[%s160_s27 + $0x60] sm:$0xff] %v245_v12  ;;  %248 = vst [vmem:[%s160_s27 + $0x68] sm:$0xff] %v247_v13  ;;  %v251_v15 = vld [vmem:[%s895_s23 + $0xf0] sm:$0xff] }
  0x25   : > { %250 = vst [vmem:[%s160_s27 + $0x70] sm:$0xff] %v249_v14  ;;  %252 = vst [vmem:[%s160_s27 + $0x78] sm:$0xff] %v251_v15 }
  0x26 PF: > { %p511_p0 = scmp.ge.s32.totalorder %s772_s21, 1  ;;  %p257_p1 = scmp.lt.s32.totalorder %s772_s21, 5 }
  0x28   : > { %p258_p2 = pnand %p511_p0, %p257_p1 }
  0x29   : > { %p291_p3 = scmp.lt.s32.totalorder (!%p258_p2), %s760_s18, 1  ;;  %s264_s28 = sand.u32 (!%p258_p2), 1, %s748_s15  }
  0x2a   : > { %261 = sbr.rel (%p258_p2) target bundleno = 421 (0x1a5), region = 66  ;;  %s512_s29 = sshll.u32 (!%p258_p2), %s264_s28, 7 }
  0x2b   : > { %s918_s9 = scalar_lea.vmem (!%p258_p2), [#allocation2], %s512_s29  ;;  %s288_s23 = sand.u32 (!%p258_p2), 1, %s740_s13  }
  0x2c   : > { %s513_s27 = sshll.u32 (!%p258_p2), %s288_s23, 3  ;;  %s517_s28 = sshll.u32 (!%p258_p2), %s760_s18, 1 }
  0x2d   : > { %s411_s29 = sadd.s32 (!%p258_p2), %s756_s17, %s517_s28  ;;  %s400_s15 = scalar_lea.sflag (!%p258_p2), [#allocation4], %s288_s23 }
  0x2e   : > { %s776_s17 = smov (!%p258_p2), [#allocation3]  }
  0x2f   : > { %v774_v16 = vmov 0.0   ;;  %s292_s4 = scalar_select %p291_p3, %s760_s18, 1  ;;  %v327_v17 = vld [vmem:[%s918_s9 + $0x78] sm:$0xff]  ;;  %v326_v18 = vld [vmem:[%s918_s9 + $0x70] sm:$0xff]  ;;  %v325_v20 = vld [vmem:[%s918_s9 + $0x68] sm:$0xff]  ;;  %vm775_vm0 = vmmov 0  }
  0x30   : > { %538 = vmatprep.subr.mxu0 %v774_v16  ;;  %v324_v22 = vld [vmem:[%s918_s9 + $0x60] sm:$0xff]  ;;  %v323_v23 = vld [vmem:[%s918_s9 + $0x58] sm:$0xff]  ;;  %v322_v24 = vld [vmem:[%s918_s9 + $0x50] sm:$0xff]  ;;  %570 = vmatprep.mubr.msk.f32.mxu0 %vm775_vm0, %v774_v16  ;;  %s668_s18 = sshll.u32 %s776_s17, 4  ;;  %s669_s18 = int_to_ptr.vmem [resolvable:$false] %s668_s18 }
  0x31   : > { %s514_s5 = sshll.u32 %s292_s4, 3  ;;  %539 = vmatpush3.msra.mxu0 %v327_v17  ;;  %v321_v25 = vld [vmem:[%s918_s9 + $0x48] sm:$0xff]  ;;  %v320_v26 = vld [vmem:[%s918_s9 + $0x40] sm:$0xff]  ;;  %v319_v27 = vld [vmem:[%s918_s9 + $0x38] sm:$0xff]  ;;  %s290_s4 = scalar_lea.vmem [#allocation3], %s513_s27 }
  0x32   : > { %s294_s22 = scalar_lea.vmem %s1006_s0, %s514_s5  ;;  %540 = vmatprep.subr.mxu0 %v774_v16  ;;  %v318_v28 = vld [vmem:[%s918_s9 + $0x30] sm:$0xff]  ;;  %v317_v29 = vld [vmem:[%s918_s9 + $0x28] sm:$0xff]  ;;  %v316_v30 = vld [vmem:[%s918_s9 + $0x20] sm:$0xff]  ;;  %s415_s5 = sshll.u32 %s290_s4, 4  ;;  %s945_s5 = int_to_ptr.vmem [resolvable:$true] %s415_s5 }
  0x33   : > { %v295_v19 = vld [vmem:[%s294_s22] sm:$0xff]  ;;  %541 = vmatpush3.msra.mxu0 %v326_v18  ;;  %v315_v31 = vld [vmem:[%s918_s9 + $0x18] sm:$0xff]  ;;  %v314_v32 = vld [vmem:[%s918_s9 + $0x10] sm:$0xff]  ;;  %s664_s26 = scalar_lea.vmem %s945_s5, 128  ;;  %s670_s27 = scalar_lea.vmem %s669_s18, 256 }
  0x34   : > { %v296_v21 = vmul.f32 %v295_v19, %v295_v19  ;;  %542 = vmatprep.subr.mxu0 %v774_v16  ;;  %v313_v33 = vld [vmem:[%s918_s9 + $0x8] sm:$0xff]  ;;  %v312_v34 = vld [vmem:[%s918_s9] sm:$0xff]  ;;  %s518_s9 = sshll.u32 %s411_s29, 7  ;;  %p665_p4 = scmp.ne.s32.totalorder %s945_s5, %s664_s26 }
  0x35   : > { %543 = vmatpush3.msra.mxu0 %v325_v20  ;;  %v515_v39 = vld [vmem:[%s1007_s1] ss:$0 sm:$0xff]  ;;  %s950_s22 = scalar_lea.hbm %s1009_s3, %s518_s9  ;;  %p671_p7 = scmp.lt.s32.totalorder %s945_s5, %s669_s18 }
  0x36   : > { %297 = vadd.xlane.f32.xlu0 %v296_v21  ;;  %544 = vmatprep.subr.mxu0 %v774_v16  ;;  %p666_p5 = pnand %p665_p4, %p876_p10  ;;  %p672_p8 = scmp.lt.s32.totalorder %s670_s27, %s664_s26 }
  0x37   : > { %545 = vmatpush3.msra.mxu0 %v324_v22 }
  0x38   : > { %546 = vmatprep.subr.mxu0 %v774_v16  ;;  %p667_p6 = pneg %p666_p5  ;;  %p673_p9 = por %p672_p8, %p671_p7 }
  0x39   : > { %547 = vmatpush3.msra.mxu0 %v323_v23 }
  0x3a   : > { %548 = vmatprep.subr.mxu0 %v774_v16  ;;  %p674_p11 = pnand %p673_p9, %p667_p6 }
  0x3b   : > { %549 = vmatpush3.msra.mxu0 %v322_v24 }
  0x3c   : > { %550 = vmatprep.subr.mxu0 %v774_v16 }
  0x3d   : > { %551 = vmatpush3.msra.mxu0 %v321_v25 }
  0x3e   : > { %552 = vmatprep.subr.mxu0 %v774_v16 }
  0x3f   : > { %553 = vmatpush3.msra.mxu0 %v320_v26 }
  0x40   : > { %554 = vmatprep.subr.mxu0 %v774_v16 }
  0x41   : > { %555 = vmatpush3.msra.mxu0 %v319_v27 }
  0x42   : > { %556 = vmatprep.subr.mxu0 %v774_v16 }
  0x43   : > { %557 = vmatpush3.msra.mxu0 %v318_v28 }
  0x44   : > { %558 = vmatprep.subr.mxu0 %v774_v16 }
  0x45   : > { %559 = vmatpush3.msra.mxu0 %v317_v29 }
  0x46   : > { %560 = vmatprep.subr.mxu0 %v774_v16 }
  0x47   : > { %561 = vmatpush3.msra.mxu0 %v316_v30 }
  0x48   : > { %562 = vmatprep.subr.mxu0 %v774_v16 }
  0x49   : > { %563 = vmatpush3.msra.mxu0 %v315_v31 }
  0x4a   : > { %564 = vmatprep.subr.mxu0 %v774_v16 }
  0x4b   : > { %565 = vmatpush3.msra.mxu0 %v314_v32 }
  0x4c   : > { %566 = vmatprep.subr.mxu0 %v774_v16 }
  0x4d   : > { %567 = vmatpush3.msra.mxu0 %v313_v33 }
  0x4e   : > { %568 = vmatprep.subr.mxu0 %v774_v16 }
  0x4f   : > { %569 = vmatpush3.msra.mxu0 %v312_v34 }
  0xbf   : > { %v298_v35 = vpop.xlane.xlu0 %297 }
  0xc0   : > { %v300_v36 = vmul.f32 0.0078125, %v298_v35 }
  0xc2   : > { %v301_v37 = vadd.f32 1e-06, %v300_v36 }
  0xc4   : > { %662 = vrsqrt.f32 %v301_v37 }
  0xd1   : > { %v663_v38 = vpop.eup %662 }
  0xd2   : > { %v303_v40 = vmul.f32 %v663_v38, %v295_v19 }
  0xd4   : > { %v311_v41 = vmul.f32 %v515_v39, %v303_v40 }
  0xd6   : > { %571 = vmatmul.mubr.f32.vlgmr.msra.gmra.mxu0 %v311_v41 }
 0x196   : > { %v394_v42 = vpop.f32.mrf.mxu0 }
 0x197   : > { %398 = vst [vmem:[%s290_s4] sm:$0xff] %v394_v42 }
 0x198   : > { %v572_v43 = vpop.f32.mrf.mxu0 }
 0x199   : > { %677 = shalt.err (!%p674_p11)
}
 0x19a   : > { %s678_s28 = scalar_lea.hbm %s950_s22, 128  ;;  %s682_s4 = scalar_lea.hbm %s1009_s3, 512 }
 0x19b   : > { %p679_p13 = scmp.ne.s32.totalorder %s950_s22, %s678_s28  ;;  %p683_p2 = scmp.lt.s32.totalorder %s950_s22, %s1009_s3 }
 0x19c   : > { %p684_p3 = scmp.lt.s32.totalorder %s682_s4, %s678_s28 }
 0x19d   : > { %p680_p0 = pnand %p679_p13, %p876_p10 }
 0x19e   : > { %p685_p4 = por %p684_p3, %p683_p2 }
 0x19f   : > { %p681_p1 = pneg %p680_p0 }
 0x1a1   : > { %p686_p5 = pnand %p685_p4, %p681_p1 }
 0x1a3   : > { %689 = shalt.err (!%p686_p5)
}
 0x1a4   : > { %573 = dma.vmem_to_hbm [thread:$0]  (%p876_p10), %s945_s5, 128, %s950_s22, %s400_s15  }
 0x1a5 PF: > { %p579_p6 = scmp.ge.s32.totalorder %s772_s21, 2  ;;  %s427_s11 = sand.u32 1, %s736_s12  }
 0x1a6   : > { %s428_s26 = scalar_lea.sflag [#allocation4], %s427_s11 }
 0x1a7   : > { %p576_p7 = pnand %p579_p6, %p883_p12 }
 0x1a9   : > { %p577_p8 = pneg %p576_p7 }
 0x1ab   : > { %731 = dma.done.wait (%p577_p8), %s428_s26, 128  }
 0x1ac   : > { %733 = vsyncadd (%p577_p8), %s428_s26, 4294967168  ;;  %s16_s21 = sadd.s32 1, %s772_s21   ;;  %s1013_s12 = smov %s740_s13 }
 0x1ad   : > { %p13_p9 = scmp.ge.s32.totalorder %s16_s21, 6   ;;  %s1014_s13 = smov %s744_s14 }
 0x1ae   : > { %s1015_s14 = smov %s881_s7  ;;  %s1016_s15 = smov %s752_s16 }
 0x1af   : > { %s1017_s16 = smov %s870_s30  ;;  %s1018_s17 = smov %s764_s19 }
 0x1b0   : > { %s1019_s18 = smov %s768_s20  ;;  %s1020_s19 = smov %s1023_s24 }
 0x1b1   : > { %s1021_s20 = smov %s1027_s25  ;;  %15 = sbr.rel (!%p13_p9) target bundleno = 6 (0x6), region = 113 }
 0x1b6   :  { %433 = vsyncpa [#allocation4], 1 }
 0x1b7   :  { %435 = vsyncpa [#allocation4 + $0x1], 1 }

// kernel: llama_forward.7
= control target key start
LH: loop header
LB: loop body
LE: loop exit
PB: predicated region body
PF: predicated region fallthrough
CT: control target
= control target key end

     0   :  { %s1098_s30 = smov 0   ;;  %s1369_s0 = inlined_call_operand.vmem [shape: f32[16,128], index: 0, kind: input, shape index: {}]   ;;  %s1370_s1 = inlined_call_operand.vmem [shape: f32[1,128], index: 1, kind: input, shape index: {}]   ;;  %s1371_s2 = inlined_call_operand.vmem [shape: f32[128,128], index: 2, kind: input, shape index: {}]   ;;  %s1372_s3 = inlined_call_operand.vmem [shape: f32[128,64], index: 3, kind: input, shape index: {}]   ;;  %s1373_s4 = inlined_call_operand.vmem [shape: f32[128,64], index: 4, kind: input, shape index: {}]   ;;  %s1374_s5 = inlined_call_operand.vmem [shape: f32[8,32], index: 5, kind: input, shape index: {}]   ;;  %s1375_s6 = inlined_call_operand.vmem [shape: f32[8,32], index: 6, kind: input, shape index: {}]   ;;  %s1376_s7 = inlined_call_operand.vmem [shape: f32[16,128], index: 7, kind: output, shape index: {0}]   ;;  %s1377_s8 = inlined_call_operand.vmem [shape: f32[16,64], index: 8, kind: output, shape index: {1}]   ;;  %s1378_s9 = inlined_call_operand.vmem [shape: f32[16,64], index: 9, kind: output, shape index: {2}]  }
   0x1 LB: > { %s844_s10 = sadd.s32 4294967295, %s1037_s30   ;;  %p848_p0 = scmp.ge.s32.totalorder %s1037_s30, 1  ;;  %s1037_s30 = sphi %s1098_s30, %s20_s30  }
   0x2   : > { %p291_p1 = scmp.lt.s32.totalorder %s1037_s30, 3 }
   0x4   : > { %p292_p2 = pnand %p848_p0, %p291_p1 }
   0x5   : > { %p333_p3 = scmp.lt.s32.totalorder (!%p292_p2), %s844_s10, 1  ;;  %s1041_s17 = smov (!%p292_p2), 112  }
   0x6   : > { %295 = sbr.rel (%p292_p2) target bundleno = 634 (0x27a), region = 48  ;;  %s1042_s18 = smov (!%p292_p2), 80  }
   0x7   : > { %s1043_s21 = smov (!%p292_p2), 32   ;;  %s1044_s22 = smov (!%p292_p2), 48  }
   0x8   : > { %s1045_s24 = smov (!%p292_p2), 16   ;;  %s1046_s28 = smov (!%p292_p2), 64  }
   0x9   : > { %s1047_s29 = smov (!%p292_p2), 96  }
   0xb   : > { %v381_v0 = vld [vmem:[%s1371_s2 + $0x78] sm:$0xff]  ;;  %v1039_v2 = vmov 0.0   ;;  %v380_v3 = vld [vmem:[%s1371_s2 + $0x70] sm:$0xff]  ;;  %s1380_s10 = smov (!%p333_p3, %s844_s10), 1  ;;  %v379_v5 = vld [vmem:[%s1371_s2 + $0x68] sm:$0xff]  ;;  %vm1040_vm0 = vmmov 0  }
   0xc   : > { %v467_v1 = vld [vmem:[%s1372_s3 + $0x78] sm:$0xff]  ;;  %907 = vmatprep.subr.mxu0 %v1039_v2  ;;  %942 = vmatprep.subr.mxu1 %v1039_v2  ;;  %v466_v4 = vld [vmem:[%s1372_s3 + $0x70] sm:$0xff]  ;;  %v465_v6 = vld [vmem:[%s1372_s3 + $0x68] sm:$0xff]  ;;  %s1128_s23 = sshll.u32 %s1380_s10, 3  ;;  %vm694_vm1 = vcmask 523264   ;;  %vm635_vm2 = vcmask 130048  }
   0xd   : > { %908 = vmatpush3.msra.mxu0 %v381_v0  ;;  %943 = vmatpush3.msra.mxu1 %v467_v1  ;;  %s336_s26 = scalar_lea.vmem %s1369_s0, %s1128_s23  ;;  %v378_v7 = vld [vmem:[%s1371_s2 + $0x60] sm:$0xff]  ;;  %v377_v11 = vld [vmem:[%s1371_s2 + $0x58] sm:$0xff]  ;;  %v376_v13 = vld [vmem:[%s1371_s2 + $0x50] sm:$0xff]  ;;  %s348_s27 = scalar_lea.vmem %s1378_s9, %s1128_s23  ;;  %vm692_vm3 = vcmask 261120   ;;  %vm696_vm4 = vcmask 785408  }
   0xe   : > { %909 = vmatprep.subr.mxu0 %v1039_v2  ;;  %944 = vmatprep.subr.mxu1 %v1039_v2  ;;  %v464_v8 = vld [vmem:[%s1372_s3 + $0x60] sm:$0xff]  ;;  %v463_v12 = vld [vmem:[%s1372_s3 + $0x58] sm:$0xff]  ;;  %v462_v14 = vld [vmem:[%s1372_s3 + $0x50] sm:$0xff]  ;;  %s340_s14 = scalar_lea.vmem %s1376_s7, %s1128_s23 }
   0xf   : > { %910 = vmatpush3.msra.mxu0 %v380_v3  ;;  %945 = vmatpush3.msra.mxu1 %v466_v4  ;;  %v1142_v9 = vld [vmem:[%s336_s26] sm:$0xff]  ;;  %v375_v15 = vld [vmem:[%s1371_s2 + $0x48] sm:$0xff]  ;;  %v373_v19 = vld [vmem:[%s1371_s2 + $0x38] sm:$0xff] }
  0x10   : > { %911 = vmatprep.subr.mxu0 %v1039_v2  ;;  %946 = vmatprep.subr.mxu1 %v1039_v2  ;;  %v350_v10 = vmul.f32 %v1142_v9, %v1142_v9  ;;  %v461_v16 = vld [vmem:[%s1372_s3 + $0x48] sm:$0xff]  ;;  %v374_v17 = vld [vmem:[%s1371_s2 + $0x40] sm:$0xff]  ;;  %v459_v20 = vld [vmem:[%s1372_s3 + $0x38] sm:$0xff] }
  0x11   : > { %912 = vmatpush3.msra.mxu0 %v379_v5  ;;  %947 = vmatpush3.msra.mxu1 %v465_v6  ;;  %v460_v18 = vld [vmem:[%s1372_s3 + $0x40] sm:$0xff]  ;;  %v372_v21 = vld [vmem:[%s1371_s2 + $0x30] sm:$0xff]  ;;  %v371_v23 = vld [vmem:[%s1371_s2 + $0x28] sm:$0xff] }
  0x12   : > { %913 = vmatprep.subr.mxu0 %v1039_v2  ;;  %948 = vmatprep.subr.mxu1 %v1039_v2  ;;  %v458_v22 = vld [vmem:[%s1372_s3 + $0x30] sm:$0xff]  ;;  %v457_v24 = vld [vmem:[%s1372_s3 + $0x28] sm:$0xff]  ;;  %v370_v25 = vld [vmem:[%s1371_s2 + $0x20] sm:$0xff] }
  0x13   : > { %914 = vmatpush3.msra.mxu0 %v378_v7  ;;  %949 = vmatpush3.msra.mxu1 %v464_v8  ;;  %v456_v26 = vld [vmem:[%s1372_s3 + $0x20] sm:$0xff]  ;;  %v369_v27 = vld [vmem:[%s1371_s2 + $0x18] sm:$0xff]  ;;  %v368_v29 = vld [vmem:[%s1371_s2 + $0x10] sm:$0xff] }
  0x14   : > { %351 = vadd.xlane.f32.xlu0 %v350_v10  ;;  %915 = vmatprep.subr.mxu0 %v1039_v2  ;;  %v455_v28 = vld [vmem:[%s1372_s3 + $0x18] sm:$0xff]  ;;  %v454_v30 = vld [vmem:[%s1372_s3 + $0x10] sm:$0xff]  ;;  %v367_v31 = vld [vmem:[%s1371_s2 + $0x8] sm:$0xff] }
  0x15   : > { %916 = vmatpush3.msra.mxu0 %v377_v11  ;;  %950 = vmatprep.subr.mxu1 %v1039_v2  ;;  %v453_v32 = vld [vmem:[%s1372_s3 + $0x8] sm:$0xff]  ;;  %v366_v33 = vld [vmem:[%s1371_s2] sm:$0xff]  ;;  %v553_v42 = vld [vmem:[%s1373_s4 + $0x78] sm:$0xff] }
  0x16   : > { %917 = vmatprep.subr.mxu0 %v1039_v2  ;;  %951 = vmatpush3.msra.mxu1 %v463_v12  ;;  %v452_v34 = vld [vmem:[%s1372_s3] sm:$0xff]  ;;  %v552_v43 = vld [vmem:[%s1373_s4 + $0x70] sm:$0xff]  ;;  %v551_v44 = vld [vmem:[%s1373_s4 + $0x68] sm:$0xff] }
  0x17   : > { %952 = vmatprep.subr.mxu1 %v1039_v2  ;;  %918 = vmatpush3.msra.mxu0 %v376_v13  ;;  %v853_v39 = vld [vmem:[%s1370_s1] ss:$0 sm:$0xff]  ;;  %v549_v46 = vld [vmem:[%s1373_s4 + $0x58] sm:$0xff]  ;;  %v548_v47 = vld [vmem:[%s1373_s4 + $0x50] sm:$0xff] }
  0x18   : > { %919 = vmatprep.subr.mxu0 %v1039_v2  ;;  %953 = vmatpush3.msra.mxu1 %v462_v14  ;;  %v550_v45 = vld [vmem:[%s1373_s4 + $0x60] sm:$0xff]  ;;  %v547_v48 = vld [vmem:[%s1373_s4 + $0x48] sm:$0xff]  ;;  %v545_v50 = vld [vmem:[%s1373_s4 + $0x38] sm:$0xff] }
  0x19   : > { %920 = vmatpush3.msra.mxu0 %v375_v15  ;;  %954 = vmatprep.subr.mxu1 %v1039_v2  ;;  %v546_v49 = vld [vmem:[%s1373_s4 + $0x40] sm:$0xff]  ;;  %v544_v51 = vld [vmem:[%s1373_s4 + $0x30] sm:$0xff]  ;;  %v543_v52 = vld [vmem:[%s1373_s4 + $0x28] sm:$0xff] }
  0x1a   : > { %921 = vmatprep.subr.mxu0 %v1039_v2  ;;  %955 = vmatpush3.msra.mxu1 %v461_v16  ;;  %v542_v53 = vld [vmem:[%s1373_s4 + $0x20] sm:$0xff]  ;;  %v541_v54 = vld [vmem:[%s1373_s4 + $0x18] sm:$0xff]  ;;  %v540_v55 = vld [vmem:[%s1373_s4 + $0x10] sm:$0xff] }
  0x1b   : > { %922 = vmatpush3.msra.mxu0 %v374_v17  ;;  %956 = vmatprep.subr.mxu1 %v1039_v2  ;;  %v539_v56 = vld [vmem:[%s1373_s4 + $0x8] sm:$0xff]  ;;  %v538_v57 = vld [vmem:[%s1373_s4] sm:$0xff] }
  0x1c   : > { %923 = vmatprep.subr.mxu0 %v1039_v2  ;;  %957 = vmatpush3.msra.mxu1 %v460_v18  ;;  %v624_v63 = vld [vmem:[%s1374_s5] sm:$0xff] }
  0x1d   : > { %924 = vmatpush3.msra.mxu0 %v373_v19  ;;  %958 = vmatprep.subr.mxu1 %v1039_v2  ;;  %v625_v4 = vld [vmem:[%s1375_s6] sm:$0xff] }
  0x1e   : > { %925 = vmatprep.subr.mxu0 %v1039_v2  ;;  %959 = vmatpush3.msra.mxu1 %v459_v20 }
  0x1f   : > { %926 = vmatpush3.msra.mxu0 %v372_v21  ;;  %960 = vmatprep.subr.mxu1 %v1039_v2 }
  0x20   : > { %927 = vmatprep.subr.mxu0 %v1039_v2  ;;  %961 = vmatpush3.msra.mxu1 %v458_v22 }
  0x21   : > { %928 = vmatpush3.msra.mxu0 %v371_v23  ;;  %962 = vmatprep.subr.mxu1 %v1039_v2 }
  0x22   : > { %929 = vmatprep.subr.mxu0 %v1039_v2  ;;  %963 = vmatpush3.msra.mxu1 %v457_v24 }
  0x23   : > { %930 = vmatpush3.msra.mxu0 %v370_v25  ;;  %964 = vmatprep.subr.mxu1 %v1039_v2 }
  0x24   : > { %931 = vmatprep.subr.mxu0 %v1039_v2  ;;  %965 = vmatpush3.msra.mxu1 %v456_v26 }
  0x25   : > { %932 = vmatpush3.msra.mxu0 %v369_v27  ;;  %966 = vmatprep.subr.mxu1 %v1039_v2 }
  0x26   : > { %933 = vmatprep.subr.mxu0 %v1039_v2  ;;  %967 = vmatpush3.msra.mxu1 %v455_v28 }
  0x27   : > { %934 = vmatpush3.msra.mxu0 %v368_v29  ;;  %968 = vmatprep.subr.mxu1 %v1039_v2 }
  0x28   : > { %935 = vmatprep.subr.mxu0 %v1039_v2  ;;  %969 = vmatpush3.msra.mxu1 %v454_v30 }
  0x29   : > { %936 = vmatpush3.msra.mxu0 %v367_v31  ;;  %970 = vmatprep.subr.mxu1 %v1039_v2 }
  0x2a   : > { %937 = vmatprep.subr.mxu0 %v1039_v2  ;;  %971 = vmatpush3.msra.mxu1 %v453_v32 }
  0x2b   : > { %938 = vmatpush3.msra.mxu0 %v366_v33  ;;  %972 = vmatprep.subr.mxu1 %v1039_v2 }
  0x2c   : > { %939 = vmatprep.mubr.msk.f32.mxu0 %vm1040_vm0, %v1039_v2  ;;  %973 = vmatpush3.msra.mxu1 %v452_v34 }
  0x2d   : > { %974 = vmatprep.mubr.msk.f32.mxu1 %vm1040_vm0, %v1039_v2  ;;  %977 = vmatprep.subr.mxu0 %v1039_v2 }
  0x9d   : > { %v352_v35 = vpop.xlane.xlu0 %351 }
  0x9e   : > { %v354_v36 = vmul.f32 0.0078125, %v352_v35 }
  0xa0   : > { %v355_v37 = vadd.f32 1e-06, %v354_v36 }
  0xa2   : > { %1029 = vrsqrt.f32 %v355_v37 }
  0xaf   : > { %v1030_v38 = vpop.eup %1029 }
  0xb0   : > { %v357_v40 = vmul.f32 %v1030_v38, %v1142_v9 }
  0xb2   : > { %v365_v41 = vmul.f32 %v853_v39, %v357_v40 }
  0xb4   : > { %940 = vmatmul.mubr.f32.vlgmr.msra.gmra.mxu0 %v365_v41  ;;  %975 = vmatmul.mubr.f32.vlgmr.msra.gmra.mxu1 %v365_v41 }
  0xb5   : > { %978 = vmatpush3.msra.mxu0 %v553_v42  ;;  %1009 = vmatprep.mubr.msk.f32.mxu0 %vm1040_vm0, %v1039_v2 }
  0xb6   : > { %979 = vmatprep.subr.mxu0 %v1039_v2 }
  0xb7   : > { %980 = vmatpush3.msra.mxu0 %v552_v43 }
  0xb8   : > { %981 = vmatprep.subr.mxu0 %v1039_v2 }
  0xb9   : > { %982 = vmatpush3.msra.mxu0 %v551_v44 }
  0xba   : > { %983 = vmatprep.subr.mxu0 %v1039_v2 }
  0xbb   : > { %984 = vmatpush3.msra.mxu0 %v550_v45 }
  0xbc   : > { %985 = vmatprep.subr.mxu0 %v1039_v2 }
  0xbd   : > { %986 = vmatpush3.msra.mxu0 %v549_v46 }
  0xbe   : > { %987 = vmatprep.subr.mxu0 %v1039_v2 }
  0xbf   : > { %988 = vmatpush3.msra.mxu0 %v548_v47 }
  0xc0   : > { %989 = vmatprep.subr.mxu0 %v1039_v2 }
  0xc1   : > { %990 = vmatpush3.msra.mxu0 %v547_v48 }
  0xc2   : > { %991 = vmatprep.subr.mxu0 %v1039_v2 }
  0xc3   : > { %992 = vmatpush3.msra.mxu0 %v546_v49 }
  0xc4   : > { %993 = vmatprep.subr.mxu0 %v1039_v2 }
  0xc5   : > { %994 = vmatpush3.msra.mxu0 %v545_v50 }
  0xc6   : > { %995 = vmatprep.subr.mxu0 %v1039_v2 }
  0xc7   : > { %996 = vmatpush3.msra.mxu0 %v544_v51 }
  0xc8   : > { %997 = vmatprep.subr.mxu0 %v1039_v2 }
  0xc9   : > { %998 = vmatpush3.msra.mxu0 %v543_v52 }
  0xca   : > { %999 = vmatprep.subr.mxu0 %v1039_v2 }
  0xcb   : > { %1000 = vmatpush3.msra.mxu0 %v542_v53 }
  0xcc   : > { %1001 = vmatprep.subr.mxu0 %v1039_v2 }
  0xcd   : > { %1002 = vmatpush3.msra.mxu0 %v541_v54 }
  0xce   : > { %1003 = vmatprep.subr.mxu0 %v1039_v2 }
  0xcf   : > { %1004 = vmatpush3.msra.mxu0 %v540_v55 }
  0xd0   : > { %1005 = vmatprep.subr.mxu0 %v1039_v2 }
  0xd1   : > { %1006 = vmatpush3.msra.mxu0 %v539_v56 }
  0xd2   : > { %1007 = vmatprep.subr.mxu0 %v1039_v2 }
  0xd3   : > { %1008 = vmatpush3.msra.mxu0 %v538_v57 }
  0xd4   : > { %1010 = vmatmul.mubr.f32.vlgmr.msra.gmra.mxu0 %v365_v41 }
 0x174   : > { %v1318_v58 = vpop.f32.mrf.mxu0  ;;  %v1320_v59 = vpop.f32.mrf.mxu1 }
 0x175   : > { %643 = vrot.lane.b32.xlu1 %v1318_v58, %s1041_s17  ;;  %v626_v60 = vsub.f32 0.0, %v1318_v58  ;;  %v699_v0 = vsub.f32 0.0, %v1320_v59  ;;  %v637_v24 = vmul.f32 %v624_v63, %v1318_v58  ;;  %v709_v31 = vmul.f32 %v624_v63, %v1320_v59 }
 0x176   : > { %v941_v61 = vpop.f32.mrf.mxu0  ;;  %v976_v62 = vpop.f32.mrf.mxu1 }
 0x177   : > { %640 = vrot.lane.b32.xlu0 %v626_v60, %s1042_s18 }
 0x179   : > { %661 = vrot.lane.b32.xlu1 %v1318_v58, %s1042_s18 }
 0x17b   : > { %648 = vrot.lane.b32.xlu0 %v624_v63, %s1043_s21 }
 0x17d   : > { %678 = vrot.lane.b32.xlu1 %v1318_v58, %s1044_s22 }
 0x17f   : > { %628 = vrot.lane.b32.xlu0 %v626_v60, %s1041_s17 }
 0x181   : > { %658 = vrot.lane.b32.xlu1 %v626_v60, %s1044_s22 }
 0x183   : > { %701 = vrot.lane.b32.xlu0 %v699_v0, %s1041_s17 }
 0x185   : > { %675 = vrot.lane.b32.xlu1 %v626_v60, %s1045_s24 }
 0x189   : > { %712 = vrot.lane.b32.xlu1 %v699_v0, %s1042_s18 }
 0x18d   : > { %715 = vrot.lane.b32.xlu1 %v1320_v59, %s1041_s17  ;;  %s344_s17 = scalar_lea.vmem %s1377_s8, %s1128_s23 }
 0x191   : > { %632 = vrot.lane.b32.xlu1 %v1318_v58, %s1045_s24 }
 0x194   : > { %v620_v1 = vpop.f32.mrf.mxu0 }
 0x195   : > { %728 = vst.msk [vmem:[%s348_s27] sm:$0xff] %vm694_vm1, %v620_v1  ;;  %665 = vrot.lane.b32.xlu1 %v624_v63, %s1046_s28 }
 0x196   : > { %v1011_v2 = vpop.f32.mrf.mxu0 }
 0x199   : > { %705 = vrot.lane.b32.xlu1 %v1320_v59, %s1045_s24 }
 0x19d   : > { %682 = vrot.lane.b32.xlu1 %v624_v63, %s1047_s29 }
 0x1e7   : > { %v644_v3 = vpop.permute.xlu1 %643 }
 0x1e9   : > { %v641_v5 = vpop.permute.xlu0 %640 }
 0x1ea   : > { %v646_v6 = vsel %vm635_vm2, %v641_v5, %v644_v3 }
 0x1eb   : > { %v652_v7 = vmul.f32 %v646_v6, %v625_v4  ;;  %v662_v8 = vpop.permute.xlu1 %661 }
 0x1ed   : > { %654 = vrot.lane.b32.xlu0 %v652_v7, %s1043_s21  ;;  %v649_v17 = vpop.permute.xlu0 %648 }
 0x1ee   : > { %v651_v35 = vmul.f32 %v649_v17, %v1318_v58  ;;  %v719_v47 = vmul.f32 %v649_v17, %v1320_v59 }
 0x1ef   : > { %v679_v9 = vpop.permute.xlu1 %678 }
 0x1f1   : > { %v629_v21 = vpop.permute.xlu0 %628 }
 0x1f3   : > { %v659_v10 = vpop.permute.xlu1 %658 }
 0x1f4   : > { %v664_v11 = vsel %vm635_vm2, %v659_v10, %v662_v8 }
 0x1f5   : > { %v669_v12 = vmul.f32 %v664_v11, %v625_v4  ;;  %v702_v28 = vpop.permute.xlu0 %701 }
 0x1f7   : > { %v676_v13 = vpop.permute.xlu1 %675  ;;  %671 = vrot.lane.b32.xlu0 %v669_v12, %s1046_s28 }
 0x1f8   : > { %v681_v14 = vsel %vm635_vm2, %v676_v13, %v679_v9 }
 0x1f9   : > { %v686_v15 = vmul.f32 %v681_v14, %v625_v4 }
 0x1fb   : > { %688 = vrot.lane.b32.xlu1 %v686_v15, %s1047_s29  ;;  %v713_v16 = vpop.permute.xlu1 %712 }
 0x1ff   : > { %v716_v18 = vpop.permute.xlu1 %715 }
 0x200   : > { %v718_v19 = vsel %vm635_vm2, %v713_v16, %v716_v18 }
 0x201   : > { %v720_v20 = vmul.f32 %v718_v19, %v625_v4 }
 0x203   : > { %v633_v22 = vpop.permute.xlu1 %632  ;;  %722 = vrot.lane.b32.xlu0 %v720_v20, %s1043_s21 }
 0x204   : > { %v636_v23 = vsel %vm635_vm2, %v629_v21, %v633_v22 }
 0x205   : > { %v638_v25 = vmul.f32 %v636_v23, %v625_v4 }
 0x207   : > { %v639_v26 = vadd.f32 %v638_v25, %v637_v24  ;;  %v666_v27 = vpop.permute.xlu1 %665 }
 0x208   : > { %v668_v36 = vmul.f32 %v666_v27, %v1318_v58 }
 0x20b   : > { %v706_v29 = vpop.permute.xlu1 %705 }
 0x20c   : > { %v708_v30 = vsel %vm635_vm2, %v702_v28, %v706_v29 }
 0x20d   : > { %v710_v32 = vmul.f32 %v708_v30, %v625_v4 }
 0x20f   : > { %v711_v33 = vadd.f32 %v710_v32, %v709_v31  ;;  %v683_v37 = vpop.permute.xlu1 %682 }
 0x210   : > { %v685_v41 = vmul.f32 %v683_v37, %v1318_v58 }
 0x25f   : > { %v655_v34 = vpop.permute.xlu0 %654 }
 0x260   : > { %v657_v39 = vadd.f32 %v655_v34, %v651_v35 }
 0x262   : > { %v693_v43 = vsel %vm692_vm3, %v639_v26, %v657_v39 }
 0x269   : > { %v672_v38 = vpop.permute.xlu0 %671 }
 0x26a   : > { %v674_v40 = vadd.f32 %v672_v38, %v668_v36 }
 0x26c   : > { %v695_v45 = vsel %vm694_vm1, %v693_v43, %v674_v40 }
 0x26d   : > { %v689_v42 = vpop.permute.xlu1 %688 }
 0x26e   : > { %v691_v44 = vadd.f32 %v689_v42, %v685_v41 }
 0x270   : > { %v697_v46 = vsel %vm696_vm4, %v695_v45, %v691_v44 }
 0x271   : > { %698 = vst [vmem:[%s340_s14] sm:$0xff] %v697_v46 }
 0x275   : > { %v723_v48 = vpop.permute.xlu0 %722 }
 0x276   : > { %v725_v49 = vadd.f32 %v723_v48, %v719_v47 }
 0x278   : > { %v726_v50 = vsel %vm692_vm3, %v711_v33, %v725_v49 }
 0x279   : > { %727 = vst.msk [vmem:[%s344_s17] sm:$0xff] %vm694_vm1, %v726_v50 }
 0x27a PF: > { %s20_s30 = sadd.s32 1, %s1037_s30  }
 0x27b   : > { %p17_p4 = scmp.ge.s32.totalorder %s20_s30, 4  }
 0x27d   :  { %19 = sbr.rel (!%p17_p4) target bundleno = 1 (0x1), region = 102 }

// kernel: llama_forward.9
= control target key start
LH: loop header
LB: loop body
LE: loop exit
PB: predicated region body
PF: predicated region fallthrough
CT: control target
= control target key end

     0   :  { %s720_s18 = smov 0   ;;  %s1041_s0 = inlined_call_operand.vmem [shape: f32[16,128], index: 0, kind: input, shape index: {}]   ;;  %s1042_s1 = inlined_call_operand.vmem [shape: f32[1,128], index: 1, kind: input, shape index: {}]   ;;  %s1043_s2 = inlined_call_operand.vmem [shape: f32[128,256], index: 2, kind: input, shape index: {}]   ;;  %s1044_s3 = inlined_call_operand.vmem [shape: f32[128,256], index: 3, kind: input, shape index: {}]   ;;  %s1045_s4 = inlined_call_operand.vmem [shape: f32[256,128], index: 4, kind: input, shape index: {}]   ;;  %s1046_s5 = inlined_call_operand.vmem [shape: f32[16,128], index: 5, kind: output, shape index: {}]  }
   0x1 LB: > { %s615_s19 = sadd.s32 4294967295, %s687_s18   ;;  %p619_p0 = scmp.ge.s32.totalorder %s687_s18, 1  ;;  %s687_s18 = sphi %s720_s18, %s15_s18  }
   0x2   : > { %p186_p1 = scmp.lt.s32.totalorder %s687_s18, 3 }
   0x4   : > { %p187_p2 = pnand %p619_p0, %p186_p1 }
   0x5   : > { %p212_p3 = scmp.lt.s32.totalorder (!%p187_p2), %s615_s19, 1 }
   0x6   : > { %190 = sbr.rel (%p187_p2) target bundleno = 612 (0x264), region = 40 }
   0xb   : > { %v268_v0 = vld [vmem:[%s1043_s2 + $0xf8] sm:$0xff]  ;;  %v267_v2 = vld [vmem:[%s1043_s2 + $0xf0] sm:$0xff]  ;;  %v266_v4 = vld [vmem:[%s1043_s2 + $0xe8] sm:$0xff]  ;;  %s1048_s19 = smov (!%p212_p3, %s615_s19), 1 }
   0xc   : > { %v371_v1 = vld [vmem:[%s1044_s3 + $0xf8] sm:$0xff]  ;;  %269 = vmatprep.subr.mxu0 %v268_v0  ;;  %v370_v3 = vld [vmem:[%s1044_s3 + $0xf0] sm:$0xff]  ;;  %v369_v5 = vld [vmem:[%s1044_s3 + $0xe8] sm:$0xff]  ;;  %s620_s21 = sshll.u32 %s1048_s19, 3 }
   0xd   : > { %372 = vmatprep.subr.mxu1 %v371_v1  ;;  %270 = vmatpush1.msra.mxu0 %v267_v2  ;;  %v265_v6 = vld [vmem:[%s1043_s2 + $0xe0] sm:$0xff]  ;;  %v264_v8 = vld [vmem:[%s1043_s2 + $0xd8] sm:$0xff]  ;;  %v263_v10 = vld [vmem:[%s1043_s2 + $0xd0] sm:$0xff]  ;;  %s215_s28 = scalar_lea.vmem %s1041_s0, %s620_s21  ;;  %v689_v2 = vmov 0.0   ;;  %s219_s20 = scalar_lea.vmem %s1046_s5, %s620_s21 }
   0xe   : > { %373 = vmatpush1.msra.mxu1 %v370_v3  ;;  %v368_v7 = vld [vmem:[%s1044_s3 + $0xe0] sm:$0xff]  ;;  %271 = vmatprep.subr.mxu0 %v266_v4  ;;  %v367_v9 = vld [vmem:[%s1044_s3 + $0xd8] sm:$0xff]  ;;  %v366_v11 = vld [vmem:[%s1044_s3 + $0xd0] sm:$0xff] }
   0xf   : > { %374 = vmatprep.subr.mxu1 %v369_v5  ;;  %272 = vmatpush1.msra.mxu0 %v265_v6  ;;  %v262_v12 = vld [vmem:[%s1043_s2 + $0xc8] sm:$0xff]  ;;  %v261_v14 = vld [vmem:[%s1043_s2 + $0xc0] sm:$0xff]  ;;  %v260_v17 = vld [vmem:[%s1043_s2 + $0xb8] sm:$0xff] }
  0x10   : > { %375 = vmatpush1.msra.mxu1 %v368_v7  ;;  %v365_v13 = vld [vmem:[%s1044_s3 + $0xc8] sm:$0xff]  ;;  %273 = vmatprep.subr.mxu0 %v264_v8  ;;  %v364_v15 = vld [vmem:[%s1044_s3 + $0xc0] sm:$0xff]  ;;  %v363_v19 = vld [vmem:[%s1044_s3 + $0xb8] sm:$0xff] }
  0x11   : > { %376 = vmatprep.subr.mxu1 %v367_v9  ;;  %v784_v16 = vld [vmem:[%s215_s28] sm:$0xff]  ;;  %274 = vmatpush1.msra.mxu0 %v263_v10  ;;  %v259_v20 = vld [vmem:[%s1043_s2 + $0xb0] sm:$0xff]  ;;  %v258_v22 = vld [vmem:[%s1043_s2 + $0xa8] sm:$0xff] }
  0x12   : > { %377 = vmatpush1.msra.mxu1 %v366_v11  ;;  %v221_v18 = vmul.f32 %v784_v16, %v784_v16  ;;  %275 = vmatprep.subr.mxu0 %v262_v12  ;;  %v362_v21 = vld [vmem:[%s1044_s3 + $0xb0] sm:$0xff]  ;;  %v361_v23 = vld [vmem:[%s1044_s3 + $0xa8] sm:$0xff]  ;;  %v257_v24 = vld [vmem:[%s1043_s2 + $0xa0] sm:$0xff] }
  0x13   : > { %378 = vmatprep.subr.mxu1 %v365_v13  ;;  %276 = vmatpush1.msra.mxu0 %v261_v14  ;;  %v360_v25 = vld [vmem:[%s1044_s3 + $0xa0] sm:$0xff]  ;;  %v256_v26 = vld [vmem:[%s1043_s2 + $0x98] sm:$0xff]  ;;  %v255_v28 = vld [vmem:[%s1043_s2 + $0x90] sm:$0xff] }
  0x14   : > { %379 = vmatpush1.msra.mxu1 %v364_v15  ;;  %222 = vadd.xlane.f32.xlu0 %v221_v18  ;;  %v359_v27 = vld [vmem:[%s1044_s3 + $0x98] sm:$0xff]  ;;  %v358_v29 = vld [vmem:[%s1044_s3 + $0x90] sm:$0xff]  ;;  %v254_v30 = vld [vmem:[%s1043_s2 + $0x88] sm:$0xff] }
  0x15   : > { %277 = vmatprep.subr.mxu0 %v260_v17  ;;  %380 = vmatprep.subr.mxu1 %v363_v19  ;;  %v357_v31 = vld [vmem:[%s1044_s3 + $0x88] sm:$0xff]  ;;  %v253_v32 = vld [vmem:[%s1043_s2 + $0x80] sm:$0xff]  ;;  %v252_v34 = vld [vmem:[%s1043_s2 + $0x78] sm:$0xff] }
  0x16   : > { %278 = vmatpush1.msra.mxu0 %v259_v20  ;;  %381 = vmatpush1.msra.mxu1 %v362_v21  ;;  %v356_v33 = vld [vmem:[%s1044_s3 + $0x80] sm:$0xff]  ;;  %v355_v35 = vld [vmem:[%s1044_s3 + $0x78] sm:$0xff]  ;;  %v251_v36 = vld [vmem:[%s1043_s2 + $0x70] sm:$0xff] }
  0x17   : > { %279 = vmatprep.subr.mxu0 %v258_v22  ;;  %382 = vmatprep.subr.mxu1 %v361_v23  ;;  %v354_v37 = vld [vmem:[%s1044_s3 + $0x70] sm:$0xff]  ;;  %v250_v38 = vld [vmem:[%s1043_s2 + $0x68] sm:$0xff]  ;;  %v249_v40 = vld [vmem:[%s1043_s2 + $0x60] sm:$0xff] }
  0x18   : > { %280 = vmatpush1.msra.mxu0 %v257_v24  ;;  %383 = vmatpush1.msra.mxu1 %v360_v25  ;;  %v353_v39 = vld [vmem:[%s1044_s3 + $0x68] sm:$0xff]  ;;  %v352_v41 = vld [vmem:[%s1044_s3 + $0x60] sm:$0xff]  ;;  %v248_v42 = vld [vmem:[%s1043_s2 + $0x58] sm:$0xff] }
  0x19   : > { %281 = vmatprep.subr.mxu0 %v256_v26  ;;  %384 = vmatprep.subr.mxu1 %v359_v27  ;;  %v351_v43 = vld [vmem:[%s1044_s3 + $0x58] sm:$0xff]  ;;  %v247_v44 = vld [vmem:[%s1043_s2 + $0x50] sm:$0xff]  ;;  %v246_v46 = vld [vmem:[%s1043_s2 + $0x48] sm:$0xff] }
  0x1a   : > { %282 = vmatpush1.msra.mxu0 %v255_v28  ;;  %385 = vmatpush1.msra.mxu1 %v358_v29  ;;  %v350_v45 = vld [vmem:[%s1044_s3 + $0x50] sm:$0xff]  ;;  %v349_v47 = vld [vmem:[%s1044_s3 + $0x48] sm:$0xff]  ;;  %v245_v48 = vld [vmem:[%s1043_s2 + $0x40] sm:$0xff] }
  0x1b   : > { %283 = vmatprep.subr.mxu0 %v254_v30  ;;  %386 = vmatprep.subr.mxu1 %v357_v31  ;;  %v348_v49 = vld [vmem:[%s1044_s3 + $0x40] sm:$0xff]  ;;  %v244_v50 = vld [vmem:[%s1043_s2 + $0x38] sm:$0xff]  ;;  %v243_v52 = vld [vmem:[%s1043_s2 + $0x30] sm:$0xff] }
  0x1c   : > { %284 = vmatpush1.msra.mxu0 %v253_v32  ;;  %387 = vmatpush1.msra.mxu1 %v356_v33  ;;  %v347_v51 = vld [vmem:[%s1044_s3 + $0x38] sm:$0xff]  ;;  %v346_v53 = vld [vmem:[%s1044_s3 + $0x30] sm:$0xff]  ;;  %v242_v54 = vld [vmem:[%s1043_s2 + $0x28] sm:$0xff] }
  0x1d   : > { %285 = vmatprep.subr.mxu0 %v252_v34  ;;  %388 = vmatprep.subr.mxu1 %v355_v35  ;;  %v345_v55 = vld [vmem:[%s1044_s3 + $0x28] sm:$0xff]  ;;  %v241_v56 = vld [vmem:[%s1043_s2 + $0x20] sm:$0xff]  ;;  %v240_v58 = vld [vmem:[%s1043_s2 + $0x18] sm:$0xff] }
  0x1e   : > { %286 = vmatpush1.msra.mxu0 %v251_v36  ;;  %389 = vmatpush1.msra.mxu1 %v354_v37  ;;  %v344_v57 = vld [vmem:[%s1044_s3 + $0x20] sm:$0xff]  ;;  %v343_v59 = vld [vmem:[%s1044_s3 + $0x18] sm:$0xff]  ;;  %v239_v60 = vld [vmem:[%s1043_s2 + $0x10] sm:$0xff] }
  0x1f   : > { %287 = vmatprep.subr.mxu0 %v250_v38  ;;  %390 = vmatprep.subr.mxu1 %v353_v39  ;;  %v342_v61 = vld [vmem:[%s1044_s3 + $0x10] sm:$0xff]  ;;  %v238_v62 = vld [vmem:[%s1043_s2 + $0x8] sm:$0xff]  ;;  %v237_v0 = vld [vmem:[%s1043_s2] sm:$0xff] }
  0x20   : > { %288 = vmatpush1.msra.mxu0 %v249_v40  ;;  %391 = vmatpush1.msra.mxu1 %v352_v41  ;;  %v341_v63 = vld [vmem:[%s1044_s3 + $0x8] sm:$0xff]  ;;  %v340_v1 = vld [vmem:[%s1044_s3] sm:$0xff]  ;;  %v490_v10 = vld [vmem:[%s1045_s4 + $0xf8] sm:$0xff] }
  0x21   : > { %289 = vmatprep.subr.mxu0 %v248_v42  ;;  %392 = vmatprep.subr.mxu1 %v351_v43  ;;  %v622_v7 = vld [vmem:[%s1042_s1] ss:$0 sm:$0xff]  ;;  %v474_v11 = vld [vmem:[%s1045_s4 + $0x78] sm:$0xff]  ;;  %v489_v12 = vld [vmem:[%s1045_s4 + $0xf0] sm:$0xff] }
  0x22   : > { %290 = vmatpush1.msra.mxu0 %v247_v44  ;;  %393 = vmatpush1.msra.mxu1 %v350_v45  ;;  %v473_v13 = vld [vmem:[%s1045_s4 + $0x70] sm:$0xff]  ;;  %v488_v14 = vld [vmem:[%s1045_s4 + $0xe8] sm:$0xff]  ;;  %v487_v17 = vld [vmem:[%s1045_s4 + $0xe0] sm:$0xff] }
  0x23   : > { %291 = vmatprep.subr.mxu0 %v246_v46  ;;  %394 = vmatprep.subr.mxu1 %v349_v47  ;;  %v472_v15 = vld [vmem:[%s1045_s4 + $0x68] sm:$0xff]  ;;  %v471_v18 = vld [vmem:[%s1045_s4 + $0x60] sm:$0xff]  ;;  %v486_v19 = vld [vmem:[%s1045_s4 + $0xd8] sm:$0xff] }
  0x24   : > { %292 = vmatpush1.msra.mxu0 %v245_v48  ;;  %395 = vmatpush1.msra.mxu1 %v348_v49  ;;  %v470_v20 = vld [vmem:[%s1045_s4 + $0x58] sm:$0xff]  ;;  %v485_v21 = vld [vmem:[%s1045_s4 + $0xd0] sm:$0xff]  ;;  %v484_v23 = vld [vmem:[%s1045_s4 + $0xc8] sm:$0xff] }
  0x25   : > { %293 = vmatprep.subr.mxu0 %v244_v50  ;;  %396 = vmatprep.subr.mxu1 %v347_v51  ;;  %v469_v22 = vld [vmem:[%s1045_s4 + $0x50] sm:$0xff]  ;;  %v468_v24 = vld [vmem:[%s1045_s4 + $0x48] sm:$0xff]  ;;  %v483_v25 = vld [vmem:[%s1045_s4 + $0xc0] sm:$0xff] }
  0x26   : > { %294 = vmatpush1.msra.mxu0 %v243_v52  ;;  %397 = vmatpush1.msra.mxu1 %v346_v53  ;;  %v467_v26 = vld [vmem:[%s1045_s4 + $0x40] sm:$0xff]  ;;  %v482_v27 = vld [vmem:[%s1045_s4 + $0xb8] sm:$0xff]  ;;  %v481_v29 = vld [vmem:[%s1045_s4 + $0xb0] sm:$0xff] }
  0x27   : > { %295 = vmatprep.subr.mxu0 %v242_v54  ;;  %398 = vmatprep.subr.mxu1 %v345_v55  ;;  %v466_v28 = vld [vmem:[%s1045_s4 + $0x38] sm:$0xff]  ;;  %v465_v30 = vld [vmem:[%s1045_s4 + $0x30] sm:$0xff]  ;;  %v480_v31 = vld [vmem:[%s1045_s4 + $0xa8] sm:$0xff] }
  0x28   : > { %296 = vmatpush1.msra.mxu0 %v241_v56  ;;  %399 = vmatpush1.msra.mxu1 %v344_v57  ;;  %v464_v32 = vld [vmem:[%s1045_s4 + $0x28] sm:$0xff]  ;;  %v479_v33 = vld [vmem:[%s1045_s4 + $0xa0] sm:$0xff]  ;;  %v478_v35 = vld [vmem:[%s1045_s4 + $0x98] sm:$0xff] }
  0x29   : > { %297 = vmatprep.subr.mxu0 %v240_v58  ;;  %400 = vmatprep.subr.mxu1 %v343_v59  ;;  %v463_v34 = vld [vmem:[%s1045_s4 + $0x20] sm:$0xff]  ;;  %v462_v36 = vld [vmem:[%s1045_s4 + $0x18] sm:$0xff]  ;;  %v477_v37 = vld [vmem:[%s1045_s4 + $0x90] sm:$0xff] }
  0x2a   : > { %298 = vmatpush1.msra.mxu0 %v239_v60  ;;  %401 = vmatpush1.msra.mxu1 %v342_v61  ;;  %v461_v38 = vld [vmem:[%s1045_s4 + $0x10] sm:$0xff]  ;;  %v476_v39 = vld [vmem:[%s1045_s4 + $0x88] sm:$0xff]  ;;  %v475_v41 = vld [vmem:[%s1045_s4 + $0x80] sm:$0xff] }
  0x2b   : > { %299 = vmatprep.subr.mxu0 %v238_v62  ;;  %402 = vmatprep.subr.mxu1 %v341_v63  ;;  %v460_v40 = vld [vmem:[%s1045_s4 + $0x8] sm:$0xff]  ;;  %v459_v42 = vld [vmem:[%s1045_s4] sm:$0xff] }
  0x2c   : > { %300 = vmatpush1.msra.mxu0 %v237_v0  ;;  %333 = vmatprep.mubr.f32.mxu0 %v689_v2 }
  0x2d   : > { %403 = vmatpush1.msra.mxu1 %v340_v1  ;;  %436 = vmatprep.mubr.f32.mxu1 %v689_v2 }
  0x2e   : > { %627 = vmatprep.subr.mxu0 %v490_v10 }
  0x9d   : > { %v223_v3 = vpop.xlane.xlu0 %222 }
  0x9e   : > { %v225_v4 = vmul.f32 0.0078125, %v223_v3 }
  0xa0   : > { %v226_v5 = vadd.f32 1e-06, %v225_v4 }
  0xa2   : > { %671 = vrsqrt.f32 %v226_v5 }
  0xaf   : > { %v672_v6 = vpop.eup %671 }
  0xb0   : > { %v228_v8 = vmul.f32 %v672_v6, %v784_v16 }
  0xb2   : > { %v236_v9 = vmul.f32 %v622_v7, %v228_v8 }
  0xb4   : > { %334 = vmatmul.mubr.f32.vlgmr.msra.gmra.mxu0 %v236_v9  ;;  %437 = vmatmul.mubr.f32.vlgmr.msra.gmra.mxu1 %v236_v9 }
  0xb5   : > { %628 = vmatpush3.msra.mxu0 %v474_v11 }
  0xb6   : > { %629 = vmatprep.subr.mxu0 %v489_v12 }
  0xb7   : > { %630 = vmatpush3.msra.mxu0 %v473_v13 }
  0xb8   : > { %631 = vmatprep.subr.mxu0 %v488_v14 }
  0xb9   : > { %632 = vmatpush3.msra.mxu0 %v472_v15 }
  0xba   : > { %633 = vmatprep.subr.mxu0 %v487_v17 }
  0xbb   : > { %634 = vmatpush3.msra.mxu0 %v471_v18 }
  0xbc   : > { %635 = vmatprep.subr.mxu0 %v486_v19 }
  0xbd   : > { %636 = vmatpush3.msra.mxu0 %v470_v20 }
  0xbe   : > { %637 = vmatprep.subr.mxu0 %v485_v21 }
  0xbf   : > { %638 = vmatpush3.msra.mxu0 %v469_v22 }
  0xc0   : > { %639 = vmatprep.subr.mxu0 %v484_v23 }
  0xc1   : > { %640 = vmatpush3.msra.mxu0 %v468_v24 }
  0xc2   : > { %641 = vmatprep.subr.mxu0 %v483_v25 }
  0xc3   : > { %642 = vmatpush3.msra.mxu0 %v467_v26 }
  0xc4   : > { %643 = vmatprep.subr.mxu0 %v482_v27 }
  0xc5   : > { %644 = vmatpush3.msra.mxu0 %v466_v28 }
  0xc6   : > { %645 = vmatprep.subr.mxu0 %v481_v29 }
  0xc7   : > { %646 = vmatpush3.msra.mxu0 %v465_v30 }
  0xc8   : > { %647 = vmatprep.subr.mxu0 %v480_v31 }
  0xc9   : > { %648 = vmatpush3.msra.mxu0 %v464_v32 }
  0xca   : > { %649 = vmatprep.subr.mxu0 %v479_v33 }
  0xcb   : > { %650 = vmatpush3.msra.mxu0 %v463_v34 }
  0xcc   : > { %651 = vmatprep.subr.mxu0 %v478_v35 }
  0xcd   : > { %652 = vmatpush3.msra.mxu0 %v462_v36 }
  0xce   : > { %653 = vmatprep.subr.mxu0 %v477_v37 }
  0xcf   : > { %654 = vmatpush3.msra.mxu0 %v461_v38 }
  0xd0   : > { %655 = vmatprep.subr.mxu0 %v476_v39 }
  0xd1   : > { %656 = vmatpush3.msra.mxu0 %v460_v40 }
  0xd2   : > { %657 = vmatprep.subr.mxu0 %v475_v41 }
  0xd3   : > { %658 = vmatpush3.msra.mxu0 %v459_v42 }
 0x174   : > { %v335_v43 = vpop.f32.mrf.mxu0  ;;  %v438_v52 = vpop.f32.mrf.mxu1 }
 0x175   : > { %v623_v44 = vmul.f32 -1.442695, %v335_v43 }
 0x176   : > { %v337_v45 = vpop.f32.mrf.mxu0  ;;  %v440_v56 = vpop.f32.mrf.mxu1 }
 0x177   : > { %673 = vpow2.f32 %v623_v44  ;;  %v624_v46 = vmul.f32 -1.442695, %v337_v45 }
 0x179   : > { %675 = vpow2.f32 %v624_v46 }
 0x184   : > { %v674_v47 = vpop.eup %673 }
 0x185   : > { %v449_v48 = vadd.f32 1.0, %v674_v47 }
 0x186   : > { %v676_v49 = vpop.eup %675 }
 0x187   : > { %677 = vrcp.f32 %v449_v48  ;;  %v450_v50 = vadd.f32 1.0, %v676_v49 }
 0x189   : > { %679 = vrcp.f32 %v450_v50 }
 0x194   : > { %v678_v51 = vpop.eup %677 }
 0x195   : > { %v455_v54 = vmul.f32 %v678_v51, %v335_v43 }
 0x196   : > { %v680_v53 = vpop.eup %679 }
 0x197   : > { %v456_v55 = vmul.f32 %v680_v53, %v337_v45  ;;  %v457_v58 = vmul.f32 %v455_v54, %v438_v52 }
 0x199   : > { %v458_v57 = vmul.f32 %v456_v55, %v440_v56 }
 0x19b   : > { %555 = vmatprep.mubr.f32.mxu0 %v458_v57 }
 0x19c   : > { %556 = vmatmul.mubr.f32.vlgmr.msra.gmra.mxu0 %v457_v58 }
 0x25c   : > { %v659_v59 = vpop.f32.mrf.mxu0 }
 0x25e   : > { %v660_v60 = vpop.f32.mrf.mxu0 }
 0x25f   : > { %v661_v61 = vadd.f32 %v660_v60, %v659_v59 }
 0x261   : > { %v558_v62 = vadd.f32 %v661_v61, %v784_v16 }
 0x263   : > { %561 = vst [vmem:[%s219_s20] sm:$0xff] %v558_v62 }
 0x264 PF: > { %s15_s18 = sadd.s32 1, %s687_s18  }
 0x265   : > { %p12_p4 = scmp.ge.s32.totalorder %s15_s18, 4  }
 0x267   :  { %14 = sbr.rel (!%p12_p4) target bundleno = 1 (0x1), region = 70 }

// kernel: llama_forward.8
= control target key start
LH: loop header
LB: loop body
LE: loop exit
PB: predicated region body
PF: predicated region fallthrough
CT: control target
= control target key end

     0   :  { %s1329_s18 = smov 0   ;;  %s1506_s0 = inlined_call_operand.vmem [shape: f32[16,128], index: 0, kind: input, shape index: {}]   ;;  %s1507_s1 = inlined_call_operand.vmem [shape: f32[16,64], index: 1, kind: input, shape index: {}]   ;;  %s1508_s2 = inlined_call_operand.vmem [shape: f32[16,64], index: 2, kind: input, shape index: {}]   ;;  %s1509_s3 = inlined_call_operand.vmem [shape: f32[128,128], index: 3, kind: input, shape index: {}]   ;;  %s1510_s4 = inlined_call_operand.vmem [shape: f32[16,128], index: 4, kind: input, shape index: {}]   ;;  %s1511_s5 = inlined_call_operand.vmem [shape: f32[16,128], index: 5, kind: output, shape index: {}]  }
   0x1 LB: > { %s1125_s19 = sadd.s32 4294967295, %s1292_s18   ;;  %p1129_p0 = scmp.ge.s32.totalorder %s1292_s18, 1  ;;  %s1292_s18 = sphi %s1329_s18, %s15_s18  }
   0x2   : > { %p213_p1 = scmp.lt.s32.totalorder %s1292_s18, 3 }
   0x4   : > { %p214_p2 = pnand %p1129_p0, %p213_p1 }
   0x5   : > { %p251_p3 = scmp.lt.s32.totalorder (!%p214_p2), %s1125_s19, 1  ;;  %s1296_s27 = smov (!%p214_p2), 96  }
   0x6   : > { %217 = sbr.rel (%p214_p2) target bundleno = 2567 (0xa07), region = 40  ;;  %s1297_s6 = smov (!%p214_p2), 64  }
   0x7   : > { %s1298_s7 = smov (!%p214_p2), 32  }
   0xb   : > { %v1294_v0 = vmov 0.0   ;;  %vm1295_vm0 = vmmov 0   ;;  %s1513_s19 = smov (!%p251_p3, %s1125_s19), 1  ;;  %vm280_vm1 = vcmask 261120   ;;  %v275_v3 = vlaneseq }
   0xc   : > { %1182 = vmatprep.subr.mxu0 %v1294_v0  ;;  %1184 = vmatprep.mubr.msk.f32.mxu0 %vm1295_vm0, %v1294_v0  ;;  %s1343_s20 = sshll.u32 %s1513_s19, 3  ;;  %vm359_vm3 = vcmask 64512   ;;  %vm945_vm4 = vcmask 523264   ;;  %vm947_vm5 = vcmask 785408  }
   0xd   : > { %1222 = vmatprep.subr.mxu1 %v1294_v0  ;;  %1254 = vmatprep.mubr.msk.f32.mxu1 %vm1295_vm0, %v1294_v0  ;;  %s258_s23 = scalar_lea.vmem %s1507_s1, %s1343_s20  ;;  %s254_s26 = scalar_lea.vmem %s1506_s0, %s1343_s20  ;;  %v1361_v4 = vshrl.u32 %v275_v3, 7  ;;  %v1363_v5 = vand.u32 127, %v275_v3 }
   0xe   : > { %v272_v1 = vld [vmem:[%s258_s23] sm:$0xff]  ;;  %s262_s30 = scalar_lea.vmem %s1508_s2, %s1343_s20  ;;  %s266_s22 = scalar_lea.vmem %s1510_s4, %s1343_s20 }
   0xf   : > { %1183 = vmatpush3.xpose.msk.msra.mxu0 %vm280_vm1, %v272_v1  ;;  %v1354_v2 = vld [vmem:[%s254_s26] sm:$0xff]  ;;  %vm279_vm2 = vcmp.le.s32.totalorder %v1363_v5, %v1361_v4  ;;  %v964_v4 = vld [vmem:[%s1509_s3 + $0x78] sm:$0xff]  ;;  %v963_v5 = vld [vmem:[%s1509_s3 + $0x70] sm:$0xff] }
  0x10   : > { %1187 = vmatprep.subr.mxu0 %v1294_v0  ;;  %444 = vrot.lane.b32.xlu1 %v1354_v2, %s1296_s27  ;;  %v273_v16 = vld [vmem:[%s262_s30] sm:$0xff] }
  0x11   : > { %1223 = vmatpush3.msra.mxu1 %v964_v4 }
  0x12   : > { %1185 = vmatmul.mubr.msk.f32.vlgmr.msra.gmra.mxu0 %vm280_vm1, %v1354_v2  ;;  %1224 = vmatprep.subr.mxu1 %v1294_v0 }
  0x13   : > { %1189 = vmatprep.mubr.msk.f32.mxu0 %vm1295_vm0, %v1294_v0  ;;  %1188 = vmatpush3.msra.mxu0 %v273_v16 }
  0x14   : > { %1192 = vmatprep.subr.mxu0 %v1294_v0  ;;  %1225 = vmatpush3.msra.mxu1 %v963_v5 }
  0x15   : > { %1226 = vmatprep.subr.mxu1 %v1294_v0 }
  0x82   : > { %v445_v20 = vpop.permute.xlu1 %444 }
  0xd2   : > { %v353_v6 = vpop.f32.mrf.mxu0 }
  0xd3   : > { %v357_v7 = vmul.f32 0.17677669, %v353_v6 }
  0xd4   : > { %v1186_v8 = vpop.f32.mrf.mxu0 }
  0xd5   : > { %v358_v9 = vsel %vm279_vm2, %v357_v7, -1e+30 }
  0xd6   : > { %v360_v10 = vsel %vm359_vm3, %v358_v9, -inf }
  0xd7   : > { %361 = vmax.xlane.f32.xlu0 %v360_v10  ;;  %v961_v10 = vld [vmem:[%s1509_s3 + $0x60] sm:$0xff] }
 0x160   : > { %v362_v11 = vpop.xlane.xlu0 %361 }
 0x161   : > { %v363_v12 = vsub.f32 %v358_v9, %v362_v11  ;;  %v962_v9 = vld [vmem:[%s1509_s3 + $0x68] sm:$0xff]  ;;  %v960_v11 = vld [vmem:[%s1509_s3 + $0x58] sm:$0xff] }
 0x162   : > { %1227 = vmatpush3.msra.mxu1 %v962_v9 }
 0x163   : > { %v364_v13 = vmul.f32 1.442695, %v363_v12  ;;  %1228 = vmatprep.subr.mxu1 %v1294_v0  ;;  %v959_v12 = vld [vmem:[%s1509_s3 + $0x50] sm:$0xff] }
 0x164   : > { %1229 = vmatpush3.msra.mxu1 %v961_v10 }
 0x165   : > { %1270 = vpow2.f32 %v364_v13  ;;  %1230 = vmatprep.subr.mxu1 %v1294_v0  ;;  %v958_v13 = vld [vmem:[%s1509_s3 + $0x48] sm:$0xff] }
 0x166   : > { %1231 = vmatpush3.msra.mxu1 %v960_v11 }
 0x167   : > { %1232 = vmatprep.subr.mxu1 %v1294_v0 }
 0x168   : > { %1233 = vmatpush3.msra.mxu1 %v959_v12 }
 0x169   : > { %1234 = vmatprep.subr.mxu1 %v1294_v0 }
 0x16a   : > { %1235 = vmatpush3.msra.mxu1 %v958_v13 }
 0x16b   : > { %1236 = vmatprep.subr.mxu1 %v1294_v0 }
 0x172   : > { %v1271_v14 = vpop.eup %1270 }
 0x173   : > { %v366_v15 = vsel %vm359_vm3, %v1271_v14, 0.0 }
 0x174   : > { %367 = vadd.xlane.f32.xlu0 %v366_v15  ;;  %v956_v15 = vld [vmem:[%s1509_s3 + $0x38] sm:$0xff] }
 0x1fd   : > { %v368_v17 = vpop.xlane.xlu0 %367 }
 0x1fe   : > { %1272 = vrcp.f32 %v368_v17  ;;  %v954_v17 = vld [vmem:[%s1509_s3 + $0x28] sm:$0xff] }
 0x20b   : > { %v1273_v18 = vpop.eup %1272 }
 0x20c   : > { %v370_v19 = vmul.f32 %v1273_v18, %v1271_v14  ;;  %v957_v14 = vld [vmem:[%s1509_s3 + $0x40] sm:$0xff] }
 0x20d   : > { %1237 = vmatpush3.msra.mxu1 %v957_v14  ;;  %v953_v18 = vld [vmem:[%s1509_s3 + $0x20] sm:$0xff] }
 0x20e   : > { %1190 = vmatmul.mubr.msk.f32.vlgmr.msra.gmra.mxu0 %vm359_vm3, %v370_v19  ;;  %1238 = vmatprep.subr.mxu1 %v1294_v0  ;;  %v952_v19 = vld [vmem:[%s1509_s3 + $0x18] sm:$0xff] }
 0x20f   : > { %1193 = vmatpush3.xpose.msk.msra.mxu0 %vm280_vm1, %v272_v1  ;;  %1194 = vmatprep.mubr.msk.f32.mxu0 %vm1295_vm0, %v1294_v0 }
 0x210   : > { %1197 = vmatprep.subr.mxu0 %v1294_v0  ;;  %1239 = vmatpush3.msra.mxu1 %v956_v15 }
 0x211   : > { %1240 = vmatprep.subr.mxu1 %v1294_v0 }
 0x212   : > { %1195 = vmatmul.mubr.msk.f32.vlgmr.msra.gmra.mxu0 %vm280_vm1, %v445_v20  ;;  %v951_v20 = vld [vmem:[%s1509_s3 + $0x10] sm:$0xff] }
 0x213   : > { %1198 = vmatpush3.msra.mxu0 %v273_v16  ;;  %1199 = vmatprep.mubr.msk.f32.mxu0 %vm1295_vm0, %v1294_v0 }
 0x214   : > { %1202 = vmatprep.subr.mxu0 %v1294_v0 }
 0x2ce   : > { %v1388_v21 = vpop.f32.mrf.mxu0 }
 0x2d0   : > { %v1191_v22 = vpop.f32.mrf.mxu0 }
 0x2d1   : > { %v950_v22 = vld [vmem:[%s1509_s3 + $0x8] sm:$0xff] }
 0x2d2   : > { %v514_v23 = vpop.f32.mrf.mxu0 }
 0x2d3   : > { %v518_v24 = vmul.f32 0.17677669, %v514_v23  ;;  %v949_v23 = vld [vmem:[%s1509_s3] sm:$0xff] }
 0x2d4   : > { %v1196_v25 = vpop.f32.mrf.mxu0 }
 0x2d5   : > { %v519_v26 = vsel %vm279_vm2, %v518_v24, -1e+30 }
 0x2d6   : > { %v520_v27 = vsel %vm359_vm3, %v519_v26, -inf }
 0x2d7   : > { %521 = vmax.xlane.f32.xlu1 %v520_v27 }
 0x2e8   : > { %696 = vrot.lane.b32.xlu1 %v273_v16, %s1296_s27  ;;  %v955_v16 = vld [vmem:[%s1509_s3 + $0x30] sm:$0xff] }
 0x2e9   : > { %1241 = vmatpush3.msra.mxu1 %v955_v16 }
 0x2ea   : > { %1242 = vmatprep.subr.mxu1 %v1294_v0 }
 0x2eb   : > { %1243 = vmatpush3.msra.mxu1 %v954_v17 }
 0x2ec   : > { %1244 = vmatprep.subr.mxu1 %v1294_v0 }
 0x2ed   : > { %1245 = vmatpush3.msra.mxu1 %v953_v18 }
 0x2ee   : > { %1246 = vmatprep.subr.mxu1 %v1294_v0 }
 0x2ef   : > { %1247 = vmatpush3.msra.mxu1 %v952_v19 }
 0x2f0   : > { %1248 = vmatprep.subr.mxu1 %v1294_v0 }
 0x2f1   : > { %1249 = vmatpush3.msra.mxu1 %v951_v20 }
 0x2f2   : > { %1250 = vmatprep.subr.mxu1 %v1294_v0 }
 0x2f3   : > { %1251 = vmatpush3.msra.mxu1 %v950_v22 }
 0x2f4   : > { %1252 = vmatprep.subr.mxu1 %v1294_v0 }
 0x2f5   : > { %1253 = vmatpush3.msra.mxu1 %v949_v23 }
 0x360   : > { %v522_v28 = vpop.xlane.xlu1 %521 }
 0x361   : > { %v523_v29 = vsub.f32 %v519_v26, %v522_v28 }
 0x363   : > { %v524_v30 = vmul.f32 1.442695, %v523_v29 }
 0x364   : > { %v697_v45 = vpop.permute.xlu1 %696 }
 0x365   : > { %1274 = vpow2.f32 %v524_v30 }
 0x372   : > { %v1275_v31 = vpop.eup %1274 }
 0x373   : > { %v526_v32 = vsel %vm359_vm3, %v1275_v31, 0.0 }
 0x374   : > { %527 = vadd.xlane.f32.xlu0 %v526_v32 }
 0x38a   : > { %606 = vrot.lane.b32.xlu0 %v272_v1, %s1296_s27 }
 0x38e   : > { %604 = vrot.lane.b32.xlu0 %v1354_v2, %s1297_s6 }
 0x3fd   : > { %v528_v33 = vpop.xlane.xlu0 %527 }
 0x3fe   : > { %1276 = vrcp.f32 %v528_v33 }
 0x401   : > { %v607_v34 = vpop.permute.xlu0 %606 }
 0x405   : > { %v605_v37 = vpop.permute.xlu0 %604 }
 0x40b   : > { %v1277_v35 = vpop.eup %1276 }
 0x40c   : > { %v530_v36 = vmul.f32 %v1277_v35, %v1275_v31  ;;  %v274_v31 = vld [vmem:[%s266_s22] sm:$0xff] }
 0x40e   : > { %1200 = vmatmul.mubr.msk.f32.vlgmr.msra.gmra.mxu0 %vm359_vm3, %v530_v36 }
 0x40f   : > { %1203 = vmatpush3.xpose.msk.msra.mxu0 %vm280_vm1, %v607_v34  ;;  %1204 = vmatprep.mubr.msk.f32.mxu0 %vm1295_vm0, %v1294_v0 }
 0x410   : > { %1207 = vmatprep.subr.mxu0 %v1294_v0 }
 0x412   : > { %1205 = vmatmul.mubr.msk.f32.vlgmr.msra.gmra.mxu0 %vm280_vm1, %v605_v37 }
 0x413   : > { %1209 = vmatprep.mubr.msk.f32.mxu0 %vm1295_vm0, %v1294_v0  ;;  %1208 = vmatpush3.msra.mxu0 %v697_v45 }
 0x414   : > { %1212 = vmatprep.subr.mxu0 %v1294_v0 }
 0x4ce   : > { %v600_v38 = vpop.f32.mrf.mxu0 }
 0x4d0   : > { %v1201_v39 = vpop.f32.mrf.mxu0 }
 0x4d2   : > { %v678_v40 = vpop.f32.mrf.mxu0 }
 0x4d3   : > { %v682_v41 = vmul.f32 0.17677669, %v678_v40 }
 0x4d4   : > { %v1206_v42 = vpop.f32.mrf.mxu0 }
 0x4d5   : > { %v683_v43 = vsel %vm279_vm2, %v682_v41, -1e+30 }
 0x4d6   : > { %v684_v44 = vsel %vm359_vm3, %v683_v43, -inf }
 0x4d7   : > { %685 = vmax.xlane.f32.xlu0 %v684_v44 }
 0x560   : > { %v686_v46 = vpop.xlane.xlu0 %685 }
 0x561   : > { %v687_v47 = vsub.f32 %v683_v43, %v686_v46 }
 0x563   : > { %v688_v48 = vmul.f32 1.442695, %v687_v47 }
 0x565   : > { %1278 = vpow2.f32 %v688_v48 }
 0x572   : > { %v1279_v49 = vpop.eup %1278 }
 0x573   : > { %v690_v50 = vsel %vm359_vm3, %v1279_v49, 0.0 }
 0x574   : > { %691 = vadd.xlane.f32.xlu1 %v690_v50 }
 0x585   : > { %772 = vrot.lane.b32.xlu1 %v1354_v2, %s1298_s7 }
 0x5fd   : > { %v692_v51 = vpop.xlane.xlu1 %691 }
 0x5fe   : > { %1280 = vrcp.f32 %v692_v51 }
 0x601   : > { %v773_v54 = vpop.permute.xlu1 %772 }
 0x60b   : > { %v1281_v52 = vpop.eup %1280 }
 0x60c   : > { %v694_v53 = vmul.f32 %v1281_v52, %v1279_v49 }
 0x60e   : > { %1210 = vmatmul.mubr.msk.f32.vlgmr.msra.gmra.mxu0 %vm359_vm3, %v694_v53 }
 0x60f   : > { %1213 = vmatpush3.xpose.msk.msra.mxu0 %vm280_vm1, %v607_v34  ;;  %1214 = vmatprep.mubr.msk.f32.mxu0 %vm1295_vm0, %v1294_v0 }
 0x610   : > { %1217 = vmatprep.subr.mxu0 %v1294_v0 }
 0x612   : > { %1215 = vmatmul.mubr.msk.f32.vlgmr.msra.gmra.mxu0 %vm280_vm1, %v773_v54 }
 0x613   : > { %1218 = vmatpush3.msra.mxu0 %v697_v45  ;;  %1219 = vmatprep.mubr.msk.f32.mxu0 %vm1295_vm0, %v1294_v0 }
 0x6ce   : > { %v768_v55 = vpop.f32.mrf.mxu0 }
 0x6d0   : > { %v1211_v56 = vpop.f32.mrf.mxu0 }
 0x6d2   : > { %v842_v57 = vpop.f32.mrf.mxu0 }
 0x6d3   : > { %v846_v58 = vmul.f32 0.17677669, %v842_v57 }
 0x6d4   : > { %v1216_v59 = vpop.f32.mrf.mxu0 }
 0x6d5   : > { %v847_v60 = vsel %vm279_vm2, %v846_v58, -1e+30 }
 0x6d6   : > { %v848_v61 = vsel %vm359_vm3, %v847_v60, -inf }
 0x6d7   : > { %849 = vmax.xlane.f32.xlu1 %v848_v61 }
 0x760   : > { %v850_v62 = vpop.xlane.xlu1 %849 }
 0x761   : > { %v851_v63 = vsub.f32 %v847_v60, %v850_v62 }
 0x763   : > { %v852_v1 = vmul.f32 1.442695, %v851_v63 }
 0x765   : > { %1282 = vpow2.f32 %v852_v1 }
 0x772   : > { %v1283_v2 = vpop.eup %1282 }
 0x773   : > { %v854_v3 = vsel %vm359_vm3, %v1283_v2, 0.0 }
 0x774   : > { %855 = vadd.xlane.f32.xlu0 %v854_v3 }
 0x78a   : > { %933 = vrot.lane.b32.xlu0 %v600_v38, %s1298_s7 }
 0x78e   : > { %937 = vrot.lane.b32.xlu0 %v768_v55, %s1297_s6 }
 0x7fd   : > { %v856_v6 = vpop.xlane.xlu0 %855 }
 0x7fe   : > { %1284 = vrcp.f32 %v856_v6 }
 0x801   : > { %v934_v26 = vpop.permute.xlu0 %933 }
 0x802   : > { %v944_v28 = vsel %vm280_vm1, %v1388_v21, %v934_v26 }
 0x805   : > { %v938_v27 = vpop.permute.xlu0 %937 }
 0x806   : > { %v946_v29 = vsel %vm945_vm4, %v944_v28, %v938_v27 }
 0x80b   : > { %v1285_v7 = vpop.eup %1284 }
 0x80c   : > { %v858_v8 = vmul.f32 %v1285_v7, %v1283_v2 }
 0x80e   : > { %1220 = vmatmul.mubr.msk.f32.vlgmr.msra.gmra.mxu0 %vm359_vm3, %v858_v8 }
 0x8ce   : > { %v928_v24 = vpop.f32.mrf.mxu0 }
 0x8cf   : > { %941 = vrot.lane.b32.xlu0 %v928_v24, %s1296_s27  ;;  %s270_s27 = scalar_lea.vmem %s1511_s5, %s1343_s20 }
 0x8d0   : > { %v1221_v25 = vpop.f32.mrf.mxu0 }
 0x941   : > { %v942_v30 = vpop.permute.xlu0 %941 }
 0x942   : > { %v948_v0 = vsel %vm947_vm5, %v946_v29, %v942_v30 }
 0x943   : > { %1255 = vmatmul.mubr.f32.vlgmr.msra.gmra.mxu1 %v948_v0 }
 0xa03   : > { %v1031_v32 = vpop.f32.mrf.mxu1 }
 0xa04   : > { %v1032_v33 = vadd.f32 %v1031_v32, %v274_v31 }
 0xa05   : > { %v1256_v34 = vpop.f32.mrf.mxu1 }
 0xa06   : > { %1035 = vst [vmem:[%s270_s27] sm:$0xff] %v1032_v33 }
 0xa07 PF: > { %s15_s18 = sadd.s32 1, %s1292_s18  }
 0xa08   : > { %p12_p4 = scmp.ge.s32.totalorder %s15_s18, 4  }
 0xa0a   :  { %14 = sbr.rel (!%p12_p4) target bundleno = 1 (0x1), region = 79 }

</bundles_post_ra>
